<compile_context>
chip_gen: v5e
topology: v5e:2x2
jax: 0.10.0
libtpu: 0.0.40
codegen_flags: <defaults>
</compile_context>

<pallas_src>
import functools

import jax
import jax.numpy as jnp
from jax import lax
from jax.experimental import pallas as pl
from jax.experimental.pallas import tpu as pltpu


def _round_up(n, m):
    return ((n + m - 1) // m) * m


def _vmem_estimate(t_chunk, b_blk, d_in, hidden, n_layers, mm_isz):
    """Rough VMEM bytes for one pipelined program instance."""
    H, L, f32 = hidden, n_layers, 4
    weights = (d_in * 4 * H + max(L - 1, 1) * H * 4 * H) * mm_isz \
        + L * 4 * H * f32
    states_in = 2 * L * b_blk * H * f32                 # h0, c0
    states_out = 2 * L * b_blk * H * f32                # hN, cN
    x_tile = t_chunk * b_blk * d_in * mm_isz
    y_tile = t_chunk * b_blk * H * f32
    scratch = (2 * L * b_blk * H + t_chunk * b_blk * H
               + t_chunk * b_blk * 4 * H) * f32
    # pipelined tiles and grid-invariant inputs are double-buffered by default
    return 2 * (weights + states_in + x_tile + y_tile) + states_out + scratch


def _pick_time_chunk(seq, b_blk, d_in, hidden, n_layers, mm_isz,
                     max_chunk, budget_bytes):
    t = max(1, min(seq, max_chunk))
    while t > 1 and _vmem_estimate(t, b_blk, d_in, hidden, n_layers,
                                   mm_isz) > budget_bytes:
        t //= 2
    return t


# ----------------------------------------------------------------------------
# Fused kernel: all layers, one (batch-block, time-chunk) per grid step.
#   grid = (n_batch_blocks, n_time_chunks), semantics ("parallel","arbitrary")
#   inputs : x     (T, Bb, D)    raw input chunk (matmul dtype)
#            h0,c0 (L, Bb, H)    initial states (f32)
#            wih0  (D, 4H)       layer-0 input weights, transposed
#            whh   (L, H, 4H)    alpha-folded, transposed recurrent weights
#            wih   (Lr, H, 4H)   transposed input weights, layers 1..L-1
#            b     (L, 1, 4H)    combined biases, all layers (f32)
#   outputs: y     (T, Bb, H)    last-layer output chunk
#            hN,cN (L, Bb, H)    final states (written on last chunk only)
#   scratch: h/c carries, inter-layer y buffer, per-chunk gates buffer.
# ----------------------------------------------------------------------------
def _fused_alpha_lstm_kernel(x_ref, h0_ref, c0_ref, wih0_ref, whh_ref,
                             wih_ref, b_ref,
                             y_ref, hN_ref, cN_ref,
                             h_sc, c_sc, ybuf_sc, gbuf_sc,
                             *, n_layers, hidden, in_features, alpha,
                             t_chunk, batch_blk, seq_len, mask_tail, unroll):
    H = hidden
    Bb = batch_blk
    cidx = pl.program_id(1)

    @pl.when(cidx == 0)
    def _():
        h_sc[...] = h0_ref[...]
        c_sc[...] = c0_ref[...]

    for l in range(n_layers):
        # --- hoisted input projection for this layer: one (T*Bb, Din)@(Din,4H)
        # MXU dot over the whole chunk (layer 0 reads the streamed x tile,
        # deeper layers read the previous layer's VMEM-resident output).
        if l == 0:
            wih = wih0_ref[...]
            xin = x_ref[...].reshape(t_chunk * Bb, in_features)
        else:
            wih = wih_ref[l - 1]
            xin = ybuf_sc[...].reshape(t_chunk * Bb, H).astype(wih.dtype)
        gflat = jnp.dot(xin, wih, preferred_element_type=jnp.float32) + b_ref[l]
        gbuf_sc[...] = gflat.reshape(t_chunk, Bb, 4 * H)

        whh = whh_ref[l]                         # (H, 4H), alpha pre-folded
        last_layer = (l == n_layers - 1)
        ydst = y_ref if last_layer else ybuf_sc

        # TODO(synk): park whh in the MXU for the whole unrolled loop via
        # pltpu.matmul_push_rhs / matmul_acc_lhs / matmul_pop when it fits.
        def step(t, carry, whh=whh, ydst=ydst):
            h, c = carry
            gates = gbuf_sc[t] + jnp.dot(h.astype(whh.dtype), whh,
                                         preferred_element_type=jnp.float32)
            if 4 * H <= 128:
                # Whole gate row fits one vreg lane width: two full-vreg
                # EUP pushes, then slice.
                sg = jax.nn.sigmoid(gates)
                tg = jnp.tanh(gates)
                i_g = sg[:, 0 * H:1 * H]
                f_g = sg[:, 1 * H:2 * H]
                g_g = tg[:, 2 * H:3 * H]
                o_g = sg[:, 3 * H:4 * H]
            else:
                # Slice first: sigmoid only on i/f/o lanes, tanh only on g.
                s_if = jax.nn.sigmoid(gates[:, 0:2 * H])
                i_g = s_if[:, :H]
                f_g = s_if[:, H:]
                g_g = jnp.tanh(gates[:, 2 * H:3 * H])
                o_g = jax.nn.sigmoid(gates[:, 3 * H:4 * H])
            cx = c if alpha == 1.0 else alpha * c
            cy = f_g * cx + i_g * g_g
            hy = o_g * jnp.tanh(cy)
            if mask_tail:
                valid = (cidx * t_chunk + t) < seq_len
                cy = jnp.where(valid, cy, c)
                hy = jnp.where(valid, hy, h)
            ydst[t] = hy.astype(ydst.dtype)
            return hy, cy

        hN, cN = lax.fori_loop(0, t_chunk, step, (h_sc[l], c_sc[l]),
                               unroll=unroll)
        h_sc[l] = hN
        c_sc[l] = cN

    @pl.when(cidx == pl.num_programs(1) - 1)
    def _():
        hN_ref[...] = h_sc[...]
        cN_ref[...] = c_sc[...]


def alpha_stacked_lstm(x, states, params, alpha=1.0, *,
                       matmul_dtype=jnp.bfloat16, time_chunk=None,
                       max_time_chunk=64, batch_split=1,
                       single_buffer_weights=False,
                       vmem_budget_bytes=24 << 20):
    """AlphaStackedLSTM.forward.

    x: (S, B, D); states: (h, c) each (L, B, H);
    params: list of (w_ih (4H, D_l), w_hh (4H, H), b_ih (4H,), b_hh (4H,)).
    Returns (y (S, B, H), (hN (L, B, H), cN (L, B, H))).
    """
    h0, c0 = states
    S, B, D = x.shape
    L, _, H = h0.shape
    assert len(params) == L
    for l in range(1, L):
        assert params[l][0].shape[1] == H, "stacked layers must take H inputs"

    f32 = jnp.float32
    mm_isz = jnp.dtype(matmul_dtype).itemsize

    nb = max(1, int(batch_split))                # >1: feed v7x's 2nd core
    Bp = _round_up(B, 8 * nb)                    # sublane-aligned per block
    Bblk = Bp // nb

    if time_chunk is not None:
        t_chunk = int(time_chunk)
    else:
        t_chunk = _pick_time_chunk(S, Bblk, D, H, L, mm_isz,
                                   max_time_chunk, vmem_budget_bytes)
    S_pad = _round_up(S, t_chunk)
    n_chunks = S_pad // t_chunk
    mask_tail = S_pad != S

    # Cap unroll so the live gate working set stays within the 64-vreg file.
    gate_vregs = max(1, (Bblk * 4 * H * 4) // 4096)
    unroll = int(max(1, min(t_chunk, max(1, 32 // gate_vregs))))

    def pad_to(a, axis, size):
        if a.shape[axis] == size:
            return a
        pad = [(0, 0)] * a.ndim
        pad[axis] = (0, size - a.shape[axis])
        return jnp.pad(a, pad)

    # Input streamed in matmul dtype (halves DMA bytes when bf16).
    x_p = pad_to(pad_to(x, 1, Bp), 0, S_pad).astype(matmul_dtype)
    h0_p = pad_to(h0.astype(f32), 1, Bp)
    c0_p = pad_to(c0.astype(f32), 1, Bp)

    # ---- weights: alpha folded into W_hh; all matmul operands in matmul_dtype.
    wih0_t = params[0][0].T.astype(matmul_dtype)                    # (D, 4H)
    whh_t = jnp.stack([(alpha * w_hh).T for (_, w_hh, _, _) in params], 0)
    whh_t = whh_t.astype(matmul_dtype)                              # (L, H, 4H)
    if L > 1:
        wih_rest = jnp.stack([params[l][0].T for l in range(1, L)], 0)
    else:  # dummy, never read
        wih_rest = jnp.zeros((1, H, 4 * H), f32)
    wih_rest = wih_rest.astype(matmul_dtype)                        # (Lr, H, 4H)
    b_all = jnp.stack([(b_ih + b_hh).reshape(1, 4 * H).astype(f32)
                       for (_, _, b_ih, b_hh) in params], 0)        # (L, 1, 4H)
    Lr = wih_rest.shape[0]

    kernel = functools.partial(
        _fused_alpha_lstm_kernel,
        n_layers=L, hidden=H, in_features=D, alpha=float(alpha),
        t_chunk=t_chunk, batch_blk=Bblk, seq_len=S, mask_tail=mask_tail,
        unroll=unroll)

    # Grid-invariant weights can be single-buffered to halve their VMEM cost
    # (enable for large L*H; off by default).
    winv = {"pipeline_mode": pl.Buffered(1)} if single_buffer_weights else {}

    grid_spec = pltpu.PrefetchScalarGridSpec(
        num_scalar_prefetch=0,
        grid=(nb, n_chunks),
        in_specs=[
            pl.BlockSpec((t_chunk, Bblk, D), lambda b, c: (c, b, 0)),   # x
            pl.BlockSpec((L, Bblk, H), lambda b, c: (0, b, 0)),         # h0
            pl.BlockSpec((L, Bblk, H), lambda b, c: (0, b, 0)),         # c0
            pl.BlockSpec((D, 4 * H), lambda b, c: (0, 0), **winv),      # Wih0^T
            pl.BlockSpec((L, H, 4 * H), lambda b, c: (0, 0, 0), **winv),  # Whh^T*a
            pl.BlockSpec((Lr, H, 4 * H), lambda b, c: (0, 0, 0), **winv),  # Wih^T l>0
            pl.BlockSpec((L, 1, 4 * H), lambda b, c: (0, 0, 0), **winv),   # biases
        ],
        out_specs=[
            pl.BlockSpec((t_chunk, Bblk, H), lambda b, c: (c, b, 0)),   # y
            pl.BlockSpec((L, Bblk, H), lambda b, c: (0, b, 0)),         # hN
            pl.BlockSpec((L, Bblk, H), lambda b, c: (0, b, 0)),         # cN
        ],
        scratch_shapes=[
            pltpu.VMEM((L, Bblk, H), f32),               # h carry
            pltpu.VMEM((L, Bblk, H), f32),               # c carry
            pltpu.VMEM((t_chunk, Bblk, H), f32),         # inter-layer y buffer
            pltpu.VMEM((t_chunk, Bblk, 4 * H), f32),     # per-chunk gates
        ],
    )

    est = _vmem_estimate(t_chunk, Bblk, D, H, L, mm_isz)
    vmem_limit = int(min(max(32 << 20, 2 * est), 56 << 20))

    y_p, hN_p, cN_p = pl.pallas_call(
        kernel,
        grid_spec=grid_spec,
        out_shape=(
            jax.ShapeDtypeStruct((S_pad, Bp, H), f32),
            jax.ShapeDtypeStruct((L, Bp, H), f32),
            jax.ShapeDtypeStruct((L, Bp, H), f32),
        ),
        compiler_params=pltpu.CompilerParams(
            # batch blocks are independent ("parallel" -> megacore/v7x);
            # the time-chunk axis carries the recurrence -> sequential.
            dimension_semantics=("parallel", "arbitrary"),
            vmem_limit_bytes=vmem_limit),
    )(x_p, h0_p, c0_p, wih0_t, whh_t, wih_rest, b_all)

    return y_p[:S, :B], (hN_p[:, :B], cN_p[:, :B])


# ----------------------------------------------------------------------------
# Pure-JAX reference (same math) for correctness checks.
# ----------------------------------------------------------------------------
def reference_forward(x, states, params, alpha=1.0):
    h_states, c_states = states
    out = x
    out_h, out_c = [], []
    for idx, (w_ih, w_hh, b_ih, b_hh) in enumerate(params):
        h, c = h_states[idx], c_states[idx]
        ys = []
        for t in range(out.shape[0]):
            hx, cx = alpha * h, alpha * c
            gates = out[t] @ w_ih.T + b_ih + hx @ w_hh.T + b_hh
            i_g, f_g, g_g, o_g = jnp.split(gates, 4, axis=-1)
            i_g = jax.nn.sigmoid(i_g)
            f_g = jax.nn.sigmoid(f_g)
            g_g = jnp.tanh(g_g)
            o_g = jax.nn.sigmoid(o_g)
            c = f_g * cx + i_g * g_g
            h = o_g * jnp.tanh(c)
            ys.append(h)
        out = jnp.stack(ys, axis=0)
        out_h.append(h)
        out_c.append(c)
    return out, (jnp.stack(out_h, axis=0), jnp.stack(out_c, axis=0))


if __name__ == "__main__":
    # Small shapes: seq=8, batch=4, input=16, hidden=32, num_layers=2.
    SEQ, BATCH, IN, HID, LAYERS = 8, 4, 16, 32, 2
    ALPHA = 0.7

    key = jax.random.PRNGKey(0)
    keys = jax.random.split(key, 3 + 4 * LAYERS)

    x = jax.random.normal(keys[0], (SEQ, BATCH, IN), dtype=jnp.float32)
    h0 = jax.random.normal(keys[1], (LAYERS, BATCH, HID), dtype=jnp.float32)
    c0 = jax.random.normal(keys[2], (LAYERS, BATCH, HID), dtype=jnp.float32)

    params = []
    for layer in range(LAYERS):
        d_in = IN if layer == 0 else HID
        kw = keys[3 + 4 * layer: 3 + 4 * (layer + 1)]
        w_ih = 0.1 * jax.random.normal(kw[0], (4 * HID, d_in), dtype=jnp.float32)
        w_hh = 0.1 * jax.random.normal(kw[1], (4 * HID, HID), dtype=jnp.float32)
        b_ih = 0.1 * jax.random.normal(kw[2], (4 * HID,), dtype=jnp.float32)
        b_hh = 0.1 * jax.random.normal(kw[3], (4 * HID,), dtype=jnp.float32)
        params.append((w_ih, w_hh, b_ih, b_hh))

    y_ref, (h_ref, c_ref) = reference_forward(x, (h0, c0), params, alpha=ALPHA)

    # Exact-math check with f32 matmul operands.
    y32, (h32, c32) = alpha_stacked_lstm(x, (h0, c0), params, alpha=ALPHA,
                                         matmul_dtype=jnp.float32)
    jax.block_until_ready((y32, h32, c32))
    assert jnp.allclose(y32, y_ref, atol=5e-5, rtol=5e-5)
    assert jnp.allclose(h32, h_ref, atol=5e-5, rtol=5e-5)
    assert jnp.allclose(c32, c_ref, atol=5e-5, rtol=5e-5)

    # Default (bf16 matmul operands, f32 carries) — looser tolerance.
    y, (hN, cN) = alpha_stacked_lstm(x, (h0, c0), params, alpha=ALPHA)
    jax.block_until_ready((y, hN, cN))
    assert jnp.allclose(y, y_ref, atol=5e-2, rtol=5e-2)
    assert jnp.allclose(hN, h_ref, atol=5e-2, rtol=5e-2)
    assert jnp.allclose(cN, c_ref, atol=5e-2, rtol=5e-2)

    print("KERNEL_OK")
</pallas_src>

<mosaic_0001>
module attributes {stable_mosaic.version = 11 : i64} {
  func.func @_fused_alpha_lstm_kernel(%arg0: i32, %arg1: i32, %arg2: memref<8x8x16xf32, #tpu.memory_space<vmem>>, %arg3: memref<2x8x32xf32, #tpu.memory_space<vmem>>, %arg4: memref<2x8x32xf32, #tpu.memory_space<vmem>>, %arg5: memref<16x128xf32, #tpu.memory_space<vmem>>, %arg6: memref<2x32x128xf32, #tpu.memory_space<vmem>>, %arg7: memref<1x32x128xf32, #tpu.memory_space<vmem>>, %arg8: memref<2x1x128xf32, #tpu.memory_space<vmem>>, %arg9: memref<8x8x32xf32, #tpu.memory_space<vmem>>, %arg10: memref<2x8x32xf32, #tpu.memory_space<vmem>>, %arg11: memref<2x8x32xf32, #tpu.memory_space<vmem>>, %arg12: memref<2x8x32xf32, #tpu.memory_space<vmem>>, %arg13: memref<2x8x32xf32, #tpu.memory_space<vmem>>, %arg14: memref<8x8x32xf32, #tpu.memory_space<vmem>>, %arg15: memref<8x8x128xf32, #tpu.memory_space<vmem>>) attributes {dimension_semantics = [#tpu.dimension_semantics<parallel>, #tpu.dimension_semantics<arbitrary>], iteration_bounds = array<i64: 1, 1>, scalar_prefetch = 0 : i64, scratch_operands = 4 : i64, tpu.core_type = #tpu.core_type<tc>, window_params = [{transform_indices = @transform_0, window_bounds = array<i64: 8, 8, 16>}, {transform_indices = @transform_1, window_bounds = array<i64: 2, 8, 32>}, {transform_indices = @transform_2, window_bounds = array<i64: 2, 8, 32>}, {pipeline_mode = #tpu.pipeline_mode<synchronous>, transform_indices = @transform_3, window_bounds = array<i64: 16, 128>}, {pipeline_mode = #tpu.pipeline_mode<synchronous>, transform_indices = @transform_4, window_bounds = array<i64: 2, 32, 128>}, {pipeline_mode = #tpu.pipeline_mode<synchronous>, transform_indices = @transform_5, window_bounds = array<i64: 1, 32, 128>}, {pipeline_mode = #tpu.pipeline_mode<synchronous>, transform_indices = @transform_6, window_bounds = array<i64: 2, 1, 128>}, {transform_indices = @transform_7, window_bounds = array<i64: 8, 8, 32>}, {transform_indices = @transform_8, window_bounds = array<i64: 2, 8, 32>}, {transform_indices = @transform_9, window_bounds = array<i64: 2, 8, 32>}]} {
    %c0_i32 = arith.constant 0 : i32
    %0 = arith.cmpi eq, %arg1, %c0_i32 : i32
    %1 = arith.extui %0 : i1 to i32
    %c0_i32_0 = arith.constant 0 : i32
    %2 = arith.cmpi ne, %1, %c0_i32_0 : i32
    scf.if %2 {
      %c0_177 = arith.constant 0 : index
      %c0_178 = arith.constant 0 : index
      %c0_179 = arith.constant 0 : index
      %467 = vector.load %arg3[%c0_177, %c0_178, %c0_179] : memref<2x8x32xf32, #tpu.memory_space<vmem>>, vector<2x8x32xf32>
      %c0_180 = arith.constant 0 : index
      %c0_181 = arith.constant 0 : index
      %c0_182 = arith.constant 0 : index
      %468 = vector.load %arg12[%c0_180, %c0_181, %c0_182] : memref<2x8x32xf32, #tpu.memory_space<vmem>>, vector<2x8x32xf32>
      tpu.vector_store %arg12[%c0_180, %c0_181, %c0_182], %467 {strides = array<i32>} : memref<2x8x32xf32, #tpu.memory_space<vmem>>, vector<2x8x32xf32>,
      %c0_183 = arith.constant 0 : index
      %c0_184 = arith.constant 0 : index
      %c0_185 = arith.constant 0 : index
      %469 = vector.load %arg4[%c0_183, %c0_184, %c0_185] : memref<2x8x32xf32, #tpu.memory_space<vmem>>, vector<2x8x32xf32>
      %c0_186 = arith.constant 0 : index
      %c0_187 = arith.constant 0 : index
      %c0_188 = arith.constant 0 : index
      %470 = vector.load %arg13[%c0_186, %c0_187, %c0_188] : memref<2x8x32xf32, #tpu.memory_space<vmem>>, vector<2x8x32xf32>
      tpu.vector_store %arg13[%c0_186, %c0_187, %c0_188], %469 {strides = array<i32>} : memref<2x8x32xf32, #tpu.memory_space<vmem>>, vector<2x8x32xf32>,
    } else {
    }
    %c0 = arith.constant 0 : index
    %c0_1 = arith.constant 0 : index
    %3 = vector.load %arg5[%c0, %c0_1] : memref<16x128xf32, #tpu.memory_space<vmem>>, vector<16x128xf32>
    %c0_2 = arith.constant 0 : index
    %c0_3 = arith.constant 0 : index
    %c0_4 = arith.constant 0 : index
    %4 = vector.load %arg2[%c0_2, %c0_3, %c0_4] : memref<8x8x16xf32, #tpu.memory_space<vmem>>, vector<8x8x16xf32>
    %5 = vector.shape_cast %4 : vector<8x8x16xf32> to vector<64x16xf32>
    %cst = arith.constant dense<0.000000e+00> : vector<64x128xf32>
    %6 = tpu.matmul %5, %3, %cst {dimension_numbers = #tpu.dot_dimension_numbers<[1], [0], [0], [1], [0, 0, 1, 1], [], []>} : vector<64x16xf32>, vector<16x128xf32>, vector<64x128xf32> -> vector<64x128xf32>
    %c0_5 = arith.constant 0 : index
    %c0_6 = arith.constant 0 : index
    %c0_7 = arith.constant 0 : index
    %7 = vector.load %arg8[%c0_5, %c0_6, %c0_7] : memref<2x1x128xf32, #tpu.memory_space<vmem>>, vector<1x1x128xf32>
    %8 = vector.shape_cast %7 : vector<1x1x128xf32> to vector<1x128xf32>
    %9 = vector.broadcast %8 : vector<1x128xf32> to vector<64x128xf32>
    %10 = arith.addf %6, %9 : vector<64x128xf32>
    %11 = vector.shape_cast %10 : vector<64x128xf32> to vector<8x8x128xf32>
    %c0_8 = arith.constant 0 : index
    %c0_9 = arith.constant 0 : index
    %c0_10 = arith.constant 0 : index
    %12 = vector.load %arg15[%c0_8, %c0_9, %c0_10] : memref<8x8x128xf32, #tpu.memory_space<vmem>>, vector<8x8x128xf32>
    tpu.vector_store %arg15[%c0_8, %c0_9, %c0_10], %11 {strides = array<i32>} : memref<8x8x128xf32, #tpu.memory_space<vmem>>, vector<8x8x128xf32>,
    %c0_11 = arith.constant 0 : index
    %c0_12 = arith.constant 0 : index
    %c0_13 = arith.constant 0 : index
    %13 = vector.load %arg6[%c0_11, %c0_12, %c0_13] : memref<2x32x128xf32, #tpu.memory_space<vmem>>, vector<1x32x128xf32>
    %14 = vector.shape_cast %13 : vector<1x32x128xf32> to vector<32x128xf32>
    %c0_14 = arith.constant 0 : index
    %c0_15 = arith.constant 0 : index
    %c0_16 = arith.constant 0 : index
    %15 = vector.load %arg12[%c0_14, %c0_15, %c0_16] : memref<2x8x32xf32, #tpu.memory_space<vmem>>, vector<1x8x32xf32>
    %16 = vector.shape_cast %15 : vector<1x8x32xf32> to vector<8x32xf32>
    %c0_17 = arith.constant 0 : index
    %c0_18 = arith.constant 0 : index
    %c0_19 = arith.constant 0 : index
    %17 = vector.load %arg13[%c0_17, %c0_18, %c0_19] : memref<2x8x32xf32, #tpu.memory_space<vmem>>, vector<1x8x32xf32>
    %18 = vector.shape_cast %17 : vector<1x8x32xf32> to vector<8x32xf32>
    %c0_i32_20 = arith.constant 0 : i32
    %19 = arith.index_cast %c0_i32_20 : i32 to index
    %c0_21 = arith.constant 0 : index
    %c0_22 = arith.constant 0 : index
    %20 = vector.load %arg15[%19, %c0_21, %c0_22] : memref<8x8x128xf32, #tpu.memory_space<vmem>>, vector<1x8x128xf32>
    %21 = vector.shape_cast %20 : vector<1x8x128xf32> to vector<8x128xf32>
    %cst_23 = arith.constant dense<0.000000e+00> : vector<8x128xf32>
    %22 = tpu.matmul %16, %14, %cst_23 {dimension_numbers = #tpu.dot_dimension_numbers<[1], [0], [0], [1], [0, 0, 1, 1], [], []>} : vector<8x32xf32>, vector<32x128xf32>, vector<8x128xf32> -> vector<8x128xf32>
    %23 = arith.addf %21, %22 : vector<8x128xf32>
    %24 = arith.negf %23 : vector<8x128xf32>
    %25 = math.exp %24 : vector<8x128xf32>
    %cst_24 = arith.constant 1.000000e+00 : f32
    %26 = vector.broadcast %cst_24 : f32 to vector<8x128xf32>
    %27 = arith.addf %26, %25 : vector<8x128xf32>
    %28 = arith.divf %26, %27 : vector<8x128xf32>
    %29 = math.tanh %23 : vector<8x128xf32>
    %30 = vector.extract_strided_slice %28 {offsets = [0, 0], sizes = [8, 32], strides = [1, 1]} : vector<8x128xf32> to vector<8x32xf32>
    %31 = vector.extract_strided_slice %28 {offsets = [0, 32], sizes = [8, 32], strides = [1, 1]} : vector<8x128xf32> to vector<8x32xf32>
    %32 = vector.extract_strided_slice %29 {offsets = [0, 64], sizes = [8, 32], strides = [1, 1]} : vector<8x128xf32> to vector<8x32xf32>
    %33 = vector.extract_strided_slice %28 {offsets = [0, 96], sizes = [8, 32], strides = [1, 1]} : vector<8x128xf32> to vector<8x32xf32>
    %cst_25 = arith.constant 0.699999988 : f32
    %34 = vector.broadcast %cst_25 : f32 to vector<8x32xf32>
    %35 = arith.mulf %34, %18 : vector<8x32xf32>
    %36 = arith.mulf %31, %35 : vector<8x32xf32>
    %37 = arith.mulf %30, %32 : vector<8x32xf32>
    %38 = arith.addf %36, %37 : vector<8x32xf32>
    %39 = math.tanh %38 : vector<8x32xf32>
    %40 = arith.mulf %33, %39 : vector<8x32xf32>
    %41 = arith.index_cast %c0_i32_20 : i32 to index
    %c0_26 = arith.constant 0 : index
    %c0_27 = arith.constant 0 : index
    %42 = vector.load %arg14[%41, %c0_26, %c0_27] : memref<8x8x32xf32, #tpu.memory_space<vmem>>, vector<1x8x32xf32>
    %43 = vector.shape_cast %42 : vector<1x8x32xf32> to vector<8x32xf32>
    %44 = vector.shape_cast %40 : vector<8x32xf32> to vector<1x8x32xf32>
    tpu.vector_store %arg14[%41, %c0_26, %c0_27], %44 {strides = array<i32>} : memref<8x8x32xf32, #tpu.memory_space<vmem>>, vector<1x8x32xf32>,
    %c1_i32 = arith.constant 1 : i32
    %45 = arith.index_cast %c1_i32 : i32 to index
    %c0_28 = arith.constant 0 : index
    %c0_29 = arith.constant 0 : index
    %46 = vector.load %arg15[%45, %c0_28, %c0_29] : memref<8x8x128xf32, #tpu.memory_space<vmem>>, vector<1x8x128xf32>
    %47 = vector.shape_cast %46 : vector<1x8x128xf32> to vector<8x128xf32>
    %cst_30 = arith.constant dense<0.000000e+00> : vector<8x128xf32>
    %48 = tpu.matmul %40, %14, %cst_30 {dimension_numbers = #tpu.dot_dimension_numbers<[1], [0], [0], [1], [0, 0, 1, 1], [], []>} : vector<8x32xf32>, vector<32x128xf32>, vector<8x128xf32> -> vector<8x128xf32>
    %49 = arith.addf %47, %48 : vector<8x128xf32>
    %50 = arith.negf %49 : vector<8x128xf32>
    %51 = math.exp %50 : vector<8x128xf32>
    %cst_31 = arith.constant 1.000000e+00 : f32
    %52 = vector.broadcast %cst_31 : f32 to vector<8x128xf32>
    %53 = arith.addf %52, %51 : vector<8x128xf32>
    %54 = arith.divf %52, %53 : vector<8x128xf32>
    %55 = math.tanh %49 : vector<8x128xf32>
    %56 = vector.extract_strided_slice %54 {offsets = [0, 0], sizes = [8, 32], strides = [1, 1]} : vector<8x128xf32> to vector<8x32xf32>
    %57 = vector.extract_strided_slice %54 {offsets = [0, 32], sizes = [8, 32], strides = [1, 1]} : vector<8x128xf32> to vector<8x32xf32>
    %58 = vector.extract_strided_slice %55 {offsets = [0, 64], sizes = [8, 32], strides = [1, 1]} : vector<8x128xf32> to vector<8x32xf32>
    %59 = vector.extract_strided_slice %54 {offsets = [0, 96], sizes = [8, 32], strides = [1, 1]} : vector<8x128xf32> to vector<8x32xf32>
    %cst_32 = arith.constant 0.699999988 : f32
    %60 = vector.broadcast %cst_32 : f32 to vector<8x32xf32>
    %61 = arith.mulf %60, %38 : vector<8x32xf32>
    %62 = arith.mulf %57, %61 : vector<8x32xf32>
    %63 = arith.mulf %56, %58 : vector<8x32xf32>
    %64 = arith.addf %62, %63 : vector<8x32xf32>
    %65 = math.tanh %64 : vector<8x32xf32>
    %66 = arith.mulf %59, %65 : vector<8x32xf32>
    %67 = arith.index_cast %c1_i32 : i32 to index
    %c0_33 = arith.constant 0 : index
    %c0_34 = arith.constant 0 : index
    %68 = vector.load %arg14[%67, %c0_33, %c0_34] : memref<8x8x32xf32, #tpu.memory_space<vmem>>, vector<1x8x32xf32>
    %69 = vector.shape_cast %68 : vector<1x8x32xf32> to vector<8x32xf32>
    %70 = vector.shape_cast %66 : vector<8x32xf32> to vector<1x8x32xf32>
    tpu.vector_store %arg14[%67, %c0_33, %c0_34], %70 {strides = array<i32>} : memref<8x8x32xf32, #tpu.memory_space<vmem>>, vector<1x8x32xf32>,
    %c2_i32 = arith.constant 2 : i32
    %71 = arith.index_cast %c2_i32 : i32 to index
    %c0_35 = arith.constant 0 : index
    %c0_36 = arith.constant 0 : index
    %72 = vector.load %arg15[%71, %c0_35, %c0_36] : memref<8x8x128xf32, #tpu.memory_space<vmem>>, vector<1x8x128xf32>
    %73 = vector.shape_cast %72 : vector<1x8x128xf32> to vector<8x128xf32>
    %cst_37 = arith.constant dense<0.000000e+00> : vector<8x128xf32>
    %74 = tpu.matmul %66, %14, %cst_37 {dimension_numbers = #tpu.dot_dimension_numbers<[1], [0], [0], [1], [0, 0, 1, 1], [], []>} : vector<8x32xf32>, vector<32x128xf32>, vector<8x128xf32> -> vector<8x128xf32>
    %75 = arith.addf %73, %74 : vector<8x128xf32>
    %76 = arith.negf %75 : vector<8x128xf32>
    %77 = math.exp %76 : vector<8x128xf32>
    %cst_38 = arith.constant 1.000000e+00 : f32
    %78 = vector.broadcast %cst_38 : f32 to vector<8x128xf32>
    %79 = arith.addf %78, %77 : vector<8x128xf32>
    %80 = arith.divf %78, %79 : vector<8x128xf32>
    %81 = math.tanh %75 : vector<8x128xf32>
    %82 = vector.extract_strided_slice %80 {offsets = [0, 0], sizes = [8, 32], strides = [1, 1]} : vector<8x128xf32> to vector<8x32xf32>
    %83 = vector.extract_strided_slice %80 {offsets = [0, 32], sizes = [8, 32], strides = [1, 1]} : vector<8x128xf32> to vector<8x32xf32>
    %84 = vector.extract_strided_slice %81 {offsets = [0, 64], sizes = [8, 32], strides = [1, 1]} : vector<8x128xf32> to vector<8x32xf32>
    %85 = vector.extract_strided_slice %80 {offsets = [0, 96], sizes = [8, 32], strides = [1, 1]} : vector<8x128xf32> to vector<8x32xf32>
    %cst_39 = arith.constant 0.699999988 : f32
    %86 = vector.broadcast %cst_39 : f32 to vector<8x32xf32>
    %87 = arith.mulf %86, %64 : vector<8x32xf32>
    %88 = arith.mulf %83, %87 : vector<8x32xf32>
    %89 = arith.mulf %82, %84 : vector<8x32xf32>
    %90 = arith.addf %88, %89 : vector<8x32xf32>
    %91 = math.tanh %90 : vector<8x32xf32>
    %92 = arith.mulf %85, %91 : vector<8x32xf32>
    %93 = arith.index_cast %c2_i32 : i32 to index
    %c0_40 = arith.constant 0 : index
    %c0_41 = arith.constant 0 : index
    %94 = vector.load %arg14[%93, %c0_40, %c0_41] : memref<8x8x32xf32, #tpu.memory_space<vmem>>, vector<1x8x32xf32>
    %95 = vector.shape_cast %94 : vector<1x8x32xf32> to vector<8x32xf32>
    %96 = vector.shape_cast %92 : vector<8x32xf32> to vector<1x8x32xf32>
    tpu.vector_store %arg14[%93, %c0_40, %c0_41], %96 {strides = array<i32>} : memref<8x8x32xf32, #tpu.memory_space<vmem>>, vector<1x8x32xf32>,
    %c3_i32 = arith.constant 3 : i32
    %97 = arith.index_cast %c3_i32 : i32 to index
    %c0_42 = arith.constant 0 : index
    %c0_43 = arith.constant 0 : index
    %98 = vector.load %arg15[%97, %c0_42, %c0_43] : memref<8x8x128xf32, #tpu.memory_space<vmem>>, vector<1x8x128xf32>
    %99 = vector.shape_cast %98 : vector<1x8x128xf32> to vector<8x128xf32>
    %cst_44 = arith.constant dense<0.000000e+00> : vector<8x128xf32>
    %100 = tpu.matmul %92, %14, %cst_44 {dimension_numbers = #tpu.dot_dimension_numbers<[1], [0], [0], [1], [0, 0, 1, 1], [], []>} : vector<8x32xf32>, vector<32x128xf32>, vector<8x128xf32> -> vector<8x128xf32>
    %101 = arith.addf %99, %100 : vector<8x128xf32>
    %102 = arith.negf %101 : vector<8x128xf32>
    %103 = math.exp %102 : vector<8x128xf32>
    %cst_45 = arith.constant 1.000000e+00 : f32
    %104 = vector.broadcast %cst_45 : f32 to vector<8x128xf32>
    %105 = arith.addf %104, %103 : vector<8x128xf32>
    %106 = arith.divf %104, %105 : vector<8x128xf32>
    %107 = math.tanh %101 : vector<8x128xf32>
    %108 = vector.extract_strided_slice %106 {offsets = [0, 0], sizes = [8, 32], strides = [1, 1]} : vector<8x128xf32> to vector<8x32xf32>
    %109 = vector.extract_strided_slice %106 {offsets = [0, 32], sizes = [8, 32], strides = [1, 1]} : vector<8x128xf32> to vector<8x32xf32>
    %110 = vector.extract_strided_slice %107 {offsets = [0, 64], sizes = [8, 32], strides = [1, 1]} : vector<8x128xf32> to vector<8x32xf32>
    %111 = vector.extract_strided_slice %106 {offsets = [0, 96], sizes = [8, 32], strides = [1, 1]} : vector<8x128xf32> to vector<8x32xf32>
    %cst_46 = arith.constant 0.699999988 : f32
    %112 = vector.broadcast %cst_46 : f32 to vector<8x32xf32>
    %113 = arith.mulf %112, %90 : vector<8x32xf32>
    %114 = arith.mulf %109, %113 : vector<8x32xf32>
    %115 = arith.mulf %108, %110 : vector<8x32xf32>
    %116 = arith.addf %114, %115 : vector<8x32xf32>
    %117 = math.tanh %116 : vector<8x32xf32>
    %118 = arith.mulf %111, %117 : vector<8x32xf32>
    %119 = arith.index_cast %c3_i32 : i32 to index
    %c0_47 = arith.constant 0 : index
    %c0_48 = arith.constant 0 : index
    %120 = vector.load %arg14[%119, %c0_47, %c0_48] : memref<8x8x32xf32, #tpu.memory_space<vmem>>, vector<1x8x32xf32>
    %121 = vector.shape_cast %120 : vector<1x8x32xf32> to vector<8x32xf32>
    %122 = vector.shape_cast %118 : vector<8x32xf32> to vector<1x8x32xf32>
    tpu.vector_store %arg14[%119, %c0_47, %c0_48], %122 {strides = array<i32>} : memref<8x8x32xf32, #tpu.memory_space<vmem>>, vector<1x8x32xf32>,
    %c4_i32 = arith.constant 4 : i32
    %123 = arith.index_cast %c4_i32 : i32 to index
    %c0_49 = arith.constant 0 : index
    %c0_50 = arith.constant 0 : index
    %124 = vector.load %arg15[%123, %c0_49, %c0_50] : memref<8x8x128xf32, #tpu.memory_space<vmem>>, vector<1x8x128xf32>
    %125 = vector.shape_cast %124 : vector<1x8x128xf32> to vector<8x128xf32>
    %cst_51 = arith.constant dense<0.000000e+00> : vector<8x128xf32>
    %126 = tpu.matmul %118, %14, %cst_51 {dimension_numbers = #tpu.dot_dimension_numbers<[1], [0], [0], [1], [0, 0, 1, 1], [], []>} : vector<8x32xf32>, vector<32x128xf32>, vector<8x128xf32> -> vector<8x128xf32>
    %127 = arith.addf %125, %126 : vector<8x128xf32>
    %128 = arith.negf %127 : vector<8x128xf32>
    %129 = math.exp %128 : vector<8x128xf32>
    %cst_52 = arith.constant 1.000000e+00 : f32
    %130 = vector.broadcast %cst_52 : f32 to vector<8x128xf32>
    %131 = arith.addf %130, %129 : vector<8x128xf32>
    %132 = arith.divf %130, %131 : vector<8x128xf32>
    %133 = math.tanh %127 : vector<8x128xf32>
    %134 = vector.extract_strided_slice %132 {offsets = [0, 0], sizes = [8, 32], strides = [1, 1]} : vector<8x128xf32> to vector<8x32xf32>
    %135 = vector.extract_strided_slice %132 {offsets = [0, 32], sizes = [8, 32], strides = [1, 1]} : vector<8x128xf32> to vector<8x32xf32>
    %136 = vector.extract_strided_slice %133 {offsets = [0, 64], sizes = [8, 32], strides = [1, 1]} : vector<8x128xf32> to vector<8x32xf32>
    %137 = vector.extract_strided_slice %132 {offsets = [0, 96], sizes = [8, 32], strides = [1, 1]} : vector<8x128xf32> to vector<8x32xf32>
    %cst_53 = arith.constant 0.699999988 : f32
    %138 = vector.broadcast %cst_53 : f32 to vector<8x32xf32>
    %139 = arith.mulf %138, %116 : vector<8x32xf32>
    %140 = arith.mulf %135, %139 : vector<8x32xf32>
    %141 = arith.mulf %134, %136 : vector<8x32xf32>
    %142 = arith.addf %140, %141 : vector<8x32xf32>
    %143 = math.tanh %142 : vector<8x32xf32>
    %144 = arith.mulf %137, %143 : vector<8x32xf32>
    %145 = arith.index_cast %c4_i32 : i32 to index
    %c0_54 = arith.constant 0 : index
    %c0_55 = arith.constant 0 : index
    %146 = vector.load %arg14[%145, %c0_54, %c0_55] : memref<8x8x32xf32, #tpu.memory_space<vmem>>, vector<1x8x32xf32>
    %147 = vector.shape_cast %146 : vector<1x8x32xf32> to vector<8x32xf32>
    %148 = vector.shape_cast %144 : vector<8x32xf32> to vector<1x8x32xf32>
    tpu.vector_store %arg14[%145, %c0_54, %c0_55], %148 {strides = array<i32>} : memref<8x8x32xf32, #tpu.memory_space<vmem>>, vector<1x8x32xf32>,
    %c5_i32 = arith.constant 5 : i32
    %149 = arith.index_cast %c5_i32 : i32 to index
    %c0_56 = arith.constant 0 : index
    %c0_57 = arith.constant 0 : index
    %150 = vector.load %arg15[%149, %c0_56, %c0_57] : memref<8x8x128xf32, #tpu.memory_space<vmem>>, vector<1x8x128xf32>
    %151 = vector.shape_cast %150 : vector<1x8x128xf32> to vector<8x128xf32>
    %cst_58 = arith.constant dense<0.000000e+00> : vector<8x128xf32>
    %152 = tpu.matmul %144, %14, %cst_58 {dimension_numbers = #tpu.dot_dimension_numbers<[1], [0], [0], [1], [0, 0, 1, 1], [], []>} : vector<8x32xf32>, vector<32x128xf32>, vector<8x128xf32> -> vector<8x128xf32>
    %153 = arith.addf %151, %152 : vector<8x128xf32>
    %154 = arith.negf %153 : vector<8x128xf32>
    %155 = math.exp %154 : vector<8x128xf32>
    %cst_59 = arith.constant 1.000000e+00 : f32
    %156 = vector.broadcast %cst_59 : f32 to vector<8x128xf32>
    %157 = arith.addf %156, %155 : vector<8x128xf32>
    %158 = arith.divf %156, %157 : vector<8x128xf32>
    %159 = math.tanh %153 : vector<8x128xf32>
    %160 = vector.extract_strided_slice %158 {offsets = [0, 0], sizes = [8, 32], strides = [1, 1]} : vector<8x128xf32> to vector<8x32xf32>
    %161 = vector.extract_strided_slice %158 {offsets = [0, 32], sizes = [8, 32], strides = [1, 1]} : vector<8x128xf32> to vector<8x32xf32>
    %162 = vector.extract_strided_slice %159 {offsets = [0, 64], sizes = [8, 32], strides = [1, 1]} : vector<8x128xf32> to vector<8x32xf32>
    %163 = vector.extract_strided_slice %158 {offsets = [0, 96], sizes = [8, 32], strides = [1, 1]} : vector<8x128xf32> to vector<8x32xf32>
    %cst_60 = arith.constant 0.699999988 : f32
    %164 = vector.broadcast %cst_60 : f32 to vector<8x32xf32>
    %165 = arith.mulf %164, %142 : vector<8x32xf32>
    %166 = arith.mulf %161, %165 : vector<8x32xf32>
    %167 = arith.mulf %160, %162 : vector<8x32xf32>
    %168 = arith.addf %166, %167 : vector<8x32xf32>
    %169 = math.tanh %168 : vector<8x32xf32>
    %170 = arith.mulf %163, %169 : vector<8x32xf32>
    %171 = arith.index_cast %c5_i32 : i32 to index
    %c0_61 = arith.constant 0 : index
    %c0_62 = arith.constant 0 : index
    %172 = vector.load %arg14[%171, %c0_61, %c0_62] : memref<8x8x32xf32, #tpu.memory_space<vmem>>, vector<1x8x32xf32>
    %173 = vector.shape_cast %172 : vector<1x8x32xf32> to vector<8x32xf32>
    %174 = vector.shape_cast %170 : vector<8x32xf32> to vector<1x8x32xf32>
    tpu.vector_store %arg14[%171, %c0_61, %c0_62], %174 {strides = array<i32>} : memref<8x8x32xf32, #tpu.memory_space<vmem>>, vector<1x8x32xf32>,
    %c6_i32 = arith.constant 6 : i32
    %175 = arith.index_cast %c6_i32 : i32 to index
    %c0_63 = arith.constant 0 : index
    %c0_64 = arith.constant 0 : index
    %176 = vector.load %arg15[%175, %c0_63, %c0_64] : memref<8x8x128xf32, #tpu.memory_space<vmem>>, vector<1x8x128xf32>
    %177 = vector.shape_cast %176 : vector<1x8x128xf32> to vector<8x128xf32>
    %cst_65 = arith.constant dense<0.000000e+00> : vector<8x128xf32>
    %178 = tpu.matmul %170, %14, %cst_65 {dimension_numbers = #tpu.dot_dimension_numbers<[1], [0], [0], [1], [0, 0, 1, 1], [], []>} : vector<8x32xf32>, vector<32x128xf32>, vector<8x128xf32> -> vector<8x128xf32>
    %179 = arith.addf %177, %178 : vector<8x128xf32>
    %180 = arith.negf %179 : vector<8x128xf32>
    %181 = math.exp %180 : vector<8x128xf32>
    %cst_66 = arith.constant 1.000000e+00 : f32
    %182 = vector.broadcast %cst_66 : f32 to vector<8x128xf32>
    %183 = arith.addf %182, %181 : vector<8x128xf32>
    %184 = arith.divf %182, %183 : vector<8x128xf32>
    %185 = math.tanh %179 : vector<8x128xf32>
    %186 = vector.extract_strided_slice %184 {offsets = [0, 0], sizes = [8, 32], strides = [1, 1]} : vector<8x128xf32> to vector<8x32xf32>
    %187 = vector.extract_strided_slice %184 {offsets = [0, 32], sizes = [8, 32], strides = [1, 1]} : vector<8x128xf32> to vector<8x32xf32>
    %188 = vector.extract_strided_slice %185 {offsets = [0, 64], sizes = [8, 32], strides = [1, 1]} : vector<8x128xf32> to vector<8x32xf32>
    %189 = vector.extract_strided_slice %184 {offsets = [0, 96], sizes = [8, 32], strides = [1, 1]} : vector<8x128xf32> to vector<8x32xf32>
    %cst_67 = arith.constant 0.699999988 : f32
    %190 = vector.broadcast %cst_67 : f32 to vector<8x32xf32>
    %191 = arith.mulf %190, %168 : vector<8x32xf32>
    %192 = arith.mulf %187, %191 : vector<8x32xf32>
    %193 = arith.mulf %186, %188 : vector<8x32xf32>
    %194 = arith.addf %192, %193 : vector<8x32xf32>
    %195 = math.tanh %194 : vector<8x32xf32>
    %196 = arith.mulf %189, %195 : vector<8x32xf32>
    %197 = arith.index_cast %c6_i32 : i32 to index
    %c0_68 = arith.constant 0 : index
    %c0_69 = arith.constant 0 : index
    %198 = vector.load %arg14[%197, %c0_68, %c0_69] : memref<8x8x32xf32, #tpu.memory_space<vmem>>, vector<1x8x32xf32>
    %199 = vector.shape_cast %198 : vector<1x8x32xf32> to vector<8x32xf32>
    %200 = vector.shape_cast %196 : vector<8x32xf32> to vector<1x8x32xf32>
    tpu.vector_store %arg14[%197, %c0_68, %c0_69], %200 {strides = array<i32>} : memref<8x8x32xf32, #tpu.memory_space<vmem>>, vector<1x8x32xf32>,
    %c7_i32 = arith.constant 7 : i32
    %201 = arith.index_cast %c7_i32 : i32 to index
    %c0_70 = arith.constant 0 : index
    %c0_71 = arith.constant 0 : index
    %202 = vector.load %arg15[%201, %c0_70, %c0_71] : memref<8x8x128xf32, #tpu.memory_space<vmem>>, vector<1x8x128xf32>
    %203 = vector.shape_cast %202 : vector<1x8x128xf32> to vector<8x128xf32>
    %cst_72 = arith.constant dense<0.000000e+00> : vector<8x128xf32>
    %204 = tpu.matmul %196, %14, %cst_72 {dimension_numbers = #tpu.dot_dimension_numbers<[1], [0], [0], [1], [0, 0, 1, 1], [], []>} : vector<8x32xf32>, vector<32x128xf32>, vector<8x128xf32> -> vector<8x128xf32>
    %205 = arith.addf %203, %204 : vector<8x128xf32>
    %206 = arith.negf %205 : vector<8x128xf32>
    %207 = math.exp %206 : vector<8x128xf32>
    %cst_73 = arith.constant 1.000000e+00 : f32
    %208 = vector.broadcast %cst_73 : f32 to vector<8x128xf32>
    %209 = arith.addf %208, %207 : vector<8x128xf32>
    %210 = arith.divf %208, %209 : vector<8x128xf32>
    %211 = math.tanh %205 : vector<8x128xf32>
    %212 = vector.extract_strided_slice %210 {offsets = [0, 0], sizes = [8, 32], strides = [1, 1]} : vector<8x128xf32> to vector<8x32xf32>
    %213 = vector.extract_strided_slice %210 {offsets = [0, 32], sizes = [8, 32], strides = [1, 1]} : vector<8x128xf32> to vector<8x32xf32>
    %214 = vector.extract_strided_slice %211 {offsets = [0, 64], sizes = [8, 32], strides = [1, 1]} : vector<8x128xf32> to vector<8x32xf32>
    %215 = vector.extract_strided_slice %210 {offsets = [0, 96], sizes = [8, 32], strides = [1, 1]} : vector<8x128xf32> to vector<8x32xf32>
    %cst_74 = arith.constant 0.699999988 : f32
    %216 = vector.broadcast %cst_74 : f32 to vector<8x32xf32>
    %217 = arith.mulf %216, %194 : vector<8x32xf32>
    %218 = arith.mulf %213, %217 : vector<8x32xf32>
    %219 = arith.mulf %212, %214 : vector<8x32xf32>
    %220 = arith.addf %218, %219 : vector<8x32xf32>
    %221 = math.tanh %220 : vector<8x32xf32>
    %222 = arith.mulf %215, %221 : vector<8x32xf32>
    %223 = arith.index_cast %c7_i32 : i32 to index
    %c0_75 = arith.constant 0 : index
    %c0_76 = arith.constant 0 : index
    %224 = vector.load %arg14[%223, %c0_75, %c0_76] : memref<8x8x32xf32, #tpu.memory_space<vmem>>, vector<1x8x32xf32>
    %225 = vector.shape_cast %224 : vector<1x8x32xf32> to vector<8x32xf32>
    %226 = vector.shape_cast %222 : vector<8x32xf32> to vector<1x8x32xf32>
    tpu.vector_store %arg14[%223, %c0_75, %c0_76], %226 {strides = array<i32>} : memref<8x8x32xf32, #tpu.memory_space<vmem>>, vector<1x8x32xf32>,
    %c8_i32 = arith.constant 8 : i32
    %c0_77 = arith.constant 0 : index
    %c0_78 = arith.constant 0 : index
    %c0_79 = arith.constant 0 : index
    %227 = vector.load %arg12[%c0_77, %c0_78, %c0_79] : memref<2x8x32xf32, #tpu.memory_space<vmem>>, vector<1x8x32xf32>
    %228 = vector.shape_cast %227 : vector<1x8x32xf32> to vector<8x32xf32>
    %229 = vector.shape_cast %222 : vector<8x32xf32> to vector<1x8x32xf32>
    tpu.vector_store %arg12[%c0_77, %c0_78, %c0_79], %229 {strides = array<i32>} : memref<2x8x32xf32, #tpu.memory_space<vmem>>, vector<1x8x32xf32>,
    %c0_80 = arith.constant 0 : index
    %c0_81 = arith.constant 0 : index
    %c0_82 = arith.constant 0 : index
    %230 = vector.load %arg13[%c0_80, %c0_81, %c0_82] : memref<2x8x32xf32, #tpu.memory_space<vmem>>, vector<1x8x32xf32>
    %231 = vector.shape_cast %230 : vector<1x8x32xf32> to vector<8x32xf32>
    %232 = vector.shape_cast %220 : vector<8x32xf32> to vector<1x8x32xf32>
    tpu.vector_store %arg13[%c0_80, %c0_81, %c0_82], %232 {strides = array<i32>} : memref<2x8x32xf32, #tpu.memory_space<vmem>>, vector<1x8x32xf32>,
    %c0_83 = arith.constant 0 : index
    %c0_84 = arith.constant 0 : index
    %c0_85 = arith.constant 0 : index
    %233 = vector.load %arg7[%c0_83, %c0_84, %c0_85] : memref<1x32x128xf32, #tpu.memory_space<vmem>>, vector<1x32x128xf32>
    %234 = vector.shape_cast %233 : vector<1x32x128xf32> to vector<32x128xf32>
    %c0_86 = arith.constant 0 : index
    %c0_87 = arith.constant 0 : index
    %c0_88 = arith.constant 0 : index
    %235 = vector.load %arg14[%c0_86, %c0_87, %c0_88] : memref<8x8x32xf32, #tpu.memory_space<vmem>>, vector<8x8x32xf32>
    %236 = vector.shape_cast %235 : vector<8x8x32xf32> to vector<64x32xf32>
    %cst_89 = arith.constant dense<0.000000e+00> : vector<64x128xf32>
    %237 = tpu.matmul %236, %234, %cst_89 {dimension_numbers = #tpu.dot_dimension_numbers<[1], [0], [0], [1], [0, 0, 1, 1], [], []>} : vector<64x32xf32>, vector<32x128xf32>, vector<64x128xf32> -> vector<64x128xf32>
    %c1 = arith.constant 1 : index
    %c0_90 = arith.constant 0 : index
    %c0_91 = arith.constant 0 : index
    %238 = vector.load %arg8[%c1, %c0_90, %c0_91] : memref<2x1x128xf32, #tpu.memory_space<vmem>>, vector<1x1x128xf32>
    %239 = vector.shape_cast %238 : vector<1x1x128xf32> to vector<1x128xf32>
    %240 = vector.broadcast %239 : vector<1x128xf32> to vector<64x128xf32>
    %241 = arith.addf %237, %240 : vector<64x128xf32>
    %242 = vector.shape_cast %241 : vector<64x128xf32> to vector<8x8x128xf32>
    %c0_92 = arith.constant 0 : index
    %c0_93 = arith.constant 0 : index
    %c0_94 = arith.constant 0 : index
    %243 = vector.load %arg15[%c0_92, %c0_93, %c0_94] : memref<8x8x128xf32, #tpu.memory_space<vmem>>, vector<8x8x128xf32>
    tpu.vector_store %arg15[%c0_92, %c0_93, %c0_94], %242 {strides = array<i32>} : memref<8x8x128xf32, #tpu.memory_space<vmem>>, vector<8x8x128xf32>,
    %c1_95 = arith.constant 1 : index
    %c0_96 = arith.constant 0 : index
    %c0_97 = arith.constant 0 : index
    %244 = vector.load %arg6[%c1_95, %c0_96, %c0_97] : memref<2x32x128xf32, #tpu.memory_space<vmem>>, vector<1x32x128xf32>
    %245 = vector.shape_cast %244 : vector<1x32x128xf32> to vector<32x128xf32>
    %c1_98 = arith.constant 1 : index
    %c0_99 = arith.constant 0 : index
    %c0_100 = arith.constant 0 : index
    %246 = vector.load %arg12[%c1_98, %c0_99, %c0_100] : memref<2x8x32xf32, #tpu.memory_space<vmem>>, vector<1x8x32xf32>
    %247 = vector.shape_cast %246 : vector<1x8x32xf32> to vector<8x32xf32>
    %c1_101 = arith.constant 1 : index
    %c0_102 = arith.constant 0 : index
    %c0_103 = arith.constant 0 : index
    %248 = vector.load %arg13[%c1_101, %c0_102, %c0_103] : memref<2x8x32xf32, #tpu.memory_space<vmem>>, vector<1x8x32xf32>
    %249 = vector.shape_cast %248 : vector<1x8x32xf32> to vector<8x32xf32>
    %c0_i32_104 = arith.constant 0 : i32
    %250 = arith.index_cast %c0_i32_104 : i32 to index
    %c0_105 = arith.constant 0 : index
    %c0_106 = arith.constant 0 : index
    %251 = vector.load %arg15[%250, %c0_105, %c0_106] : memref<8x8x128xf32, #tpu.memory_space<vmem>>, vector<1x8x128xf32>
    %252 = vector.shape_cast %251 : vector<1x8x128xf32> to vector<8x128xf32>
    %cst_107 = arith.constant dense<0.000000e+00> : vector<8x128xf32>
    %253 = tpu.matmul %247, %245, %cst_107 {dimension_numbers = #tpu.dot_dimension_numbers<[1], [0], [0], [1], [0, 0, 1, 1], [], []>} : vector<8x32xf32>, vector<32x128xf32>, vector<8x128xf32> -> vector<8x128xf32>
    %254 = arith.addf %252, %253 : vector<8x128xf32>
    %255 = arith.negf %254 : vector<8x128xf32>
    %256 = math.exp %255 : vector<8x128xf32>
    %cst_108 = arith.constant 1.000000e+00 : f32
    %257 = vector.broadcast %cst_108 : f32 to vector<8x128xf32>
    %258 = arith.addf %257, %256 : vector<8x128xf32>
    %259 = arith.divf %257, %258 : vector<8x128xf32>
    %260 = math.tanh %254 : vector<8x128xf32>
    %261 = vector.extract_strided_slice %259 {offsets = [0, 0], sizes = [8, 32], strides = [1, 1]} : vector<8x128xf32> to vector<8x32xf32>
    %262 = vector.extract_strided_slice %259 {offsets = [0, 32], sizes = [8, 32], strides = [1, 1]} : vector<8x128xf32> to vector<8x32xf32>
    %263 = vector.extract_strided_slice %260 {offsets = [0, 64], sizes = [8, 32], strides = [1, 1]} : vector<8x128xf32> to vector<8x32xf32>
    %264 = vector.extract_strided_slice %259 {offsets = [0, 96], sizes = [8, 32], strides = [1, 1]} : vector<8x128xf32> to vector<8x32xf32>
    %cst_109 = arith.constant 0.699999988 : f32
    %265 = vector.broadcast %cst_109 : f32 to vector<8x32xf32>
    %266 = arith.mulf %265, %249 : vector<8x32xf32>
    %267 = arith.mulf %262, %266 : vector<8x32xf32>
    %268 = arith.mulf %261, %263 : vector<8x32xf32>
    %269 = arith.addf %267, %268 : vector<8x32xf32>
    %270 = math.tanh %269 : vector<8x32xf32>
    %271 = arith.mulf %264, %270 : vector<8x32xf32>
    %272 = arith.index_cast %c0_i32_104 : i32 to index
    %c0_110 = arith.constant 0 : index
    %c0_111 = arith.constant 0 : index
    %273 = vector.load %arg9[%272, %c0_110, %c0_111] : memref<8x8x32xf32, #tpu.memory_space<vmem>>, vector<1x8x32xf32>
    %274 = vector.shape_cast %273 : vector<1x8x32xf32> to vector<8x32xf32>
    %275 = vector.shape_cast %271 : vector<8x32xf32> to vector<1x8x32xf32>
    tpu.vector_store %arg9[%272, %c0_110, %c0_111], %275 {strides = array<i32>} : memref<8x8x32xf32, #tpu.memory_space<vmem>>, vector<1x8x32xf32>,
    %c1_i32_112 = arith.constant 1 : i32
    %276 = arith.index_cast %c1_i32_112 : i32 to index
    %c0_113 = arith.constant 0 : index
    %c0_114 = arith.constant 0 : index
    %277 = vector.load %arg15[%276, %c0_113, %c0_114] : memref<8x8x128xf32, #tpu.memory_space<vmem>>, vector<1x8x128xf32>
    %278 = vector.shape_cast %277 : vector<1x8x128xf32> to vector<8x128xf32>
    %cst_115 = arith.constant dense<0.000000e+00> : vector<8x128xf32>
    %279 = tpu.matmul %271, %245, %cst_115 {dimension_numbers = #tpu.dot_dimension_numbers<[1], [0], [0], [1], [0, 0, 1, 1], [], []>} : vector<8x32xf32>, vector<32x128xf32>, vector<8x128xf32> -> vector<8x128xf32>
    %280 = arith.addf %278, %279 : vector<8x128xf32>
    %281 = arith.negf %280 : vector<8x128xf32>
    %282 = math.exp %281 : vector<8x128xf32>
    %cst_116 = arith.constant 1.000000e+00 : f32
    %283 = vector.broadcast %cst_116 : f32 to vector<8x128xf32>
    %284 = arith.addf %283, %282 : vector<8x128xf32>
    %285 = arith.divf %283, %284 : vector<8x128xf32>
    %286 = math.tanh %280 : vector<8x128xf32>
    %287 = vector.extract_strided_slice %285 {offsets = [0, 0], sizes = [8, 32], strides = [1, 1]} : vector<8x128xf32> to vector<8x32xf32>
    %288 = vector.extract_strided_slice %285 {offsets = [0, 32], sizes = [8, 32], strides = [1, 1]} : vector<8x128xf32> to vector<8x32xf32>
    %289 = vector.extract_strided_slice %286 {offsets = [0, 64], sizes = [8, 32], strides = [1, 1]} : vector<8x128xf32> to vector<8x32xf32>
    %290 = vector.extract_strided_slice %285 {offsets = [0, 96], sizes = [8, 32], strides = [1, 1]} : vector<8x128xf32> to vector<8x32xf32>
    %cst_117 = arith.constant 0.699999988 : f32
    %291 = vector.broadcast %cst_117 : f32 to vector<8x32xf32>
    %292 = arith.mulf %291, %269 : vector<8x32xf32>
    %293 = arith.mulf %288, %292 : vector<8x32xf32>
    %294 = arith.mulf %287, %289 : vector<8x32xf32>
    %295 = arith.addf %293, %294 : vector<8x32xf32>
    %296 = math.tanh %295 : vector<8x32xf32>
    %297 = arith.mulf %290, %296 : vector<8x32xf32>
    %298 = arith.index_cast %c1_i32_112 : i32 to index
    %c0_118 = arith.constant 0 : index
    %c0_119 = arith.constant 0 : index
    %299 = vector.load %arg9[%298, %c0_118, %c0_119] : memref<8x8x32xf32, #tpu.memory_space<vmem>>, vector<1x8x32xf32>
    %300 = vector.shape_cast %299 : vector<1x8x32xf32> to vector<8x32xf32>
    %301 = vector.shape_cast %297 : vector<8x32xf32> to vector<1x8x32xf32>
    tpu.vector_store %arg9[%298, %c0_118, %c0_119], %301 {strides = array<i32>} : memref<8x8x32xf32, #tpu.memory_space<vmem>>, vector<1x8x32xf32>,
    %c2_i32_120 = arith.constant 2 : i32
    %302 = arith.index_cast %c2_i32_120 : i32 to index
    %c0_121 = arith.constant 0 : index
    %c0_122 = arith.constant 0 : index
    %303 = vector.load %arg15[%302, %c0_121, %c0_122] : memref<8x8x128xf32, #tpu.memory_space<vmem>>, vector<1x8x128xf32>
    %304 = vector.shape_cast %303 : vector<1x8x128xf32> to vector<8x128xf32>
    %cst_123 = arith.constant dense<0.000000e+00> : vector<8x128xf32>
    %305 = tpu.matmul %297, %245, %cst_123 {dimension_numbers = #tpu.dot_dimension_numbers<[1], [0], [0], [1], [0, 0, 1, 1], [], []>} : vector<8x32xf32>, vector<32x128xf32>, vector<8x128xf32> -> vector<8x128xf32>
    %306 = arith.addf %304, %305 : vector<8x128xf32>
    %307 = arith.negf %306 : vector<8x128xf32>
    %308 = math.exp %307 : vector<8x128xf32>
    %cst_124 = arith.constant 1.000000e+00 : f32
    %309 = vector.broadcast %cst_124 : f32 to vector<8x128xf32>
    %310 = arith.addf %309, %308 : vector<8x128xf32>
    %311 = arith.divf %309, %310 : vector<8x128xf32>
    %312 = math.tanh %306 : vector<8x128xf32>
    %313 = vector.extract_strided_slice %311 {offsets = [0, 0], sizes = [8, 32], strides = [1, 1]} : vector<8x128xf32> to vector<8x32xf32>
    %314 = vector.extract_strided_slice %311 {offsets = [0, 32], sizes = [8, 32], strides = [1, 1]} : vector<8x128xf32> to vector<8x32xf32>
    %315 = vector.extract_strided_slice %312 {offsets = [0, 64], sizes = [8, 32], strides = [1, 1]} : vector<8x128xf32> to vector<8x32xf32>
    %316 = vector.extract_strided_slice %311 {offsets = [0, 96], sizes = [8, 32], strides = [1, 1]} : vector<8x128xf32> to vector<8x32xf32>
    %cst_125 = arith.constant 0.699999988 : f32
    %317 = vector.broadcast %cst_125 : f32 to vector<8x32xf32>
    %318 = arith.mulf %317, %295 : vector<8x32xf32>
    %319 = arith.mulf %314, %318 : vector<8x32xf32>
    %320 = arith.mulf %313, %315 : vector<8x32xf32>
    %321 = arith.addf %319, %320 : vector<8x32xf32>
    %322 = math.tanh %321 : vector<8x32xf32>
    %323 = arith.mulf %316, %322 : vector<8x32xf32>
    %324 = arith.index_cast %c2_i32_120 : i32 to index
    %c0_126 = arith.constant 0 : index
    %c0_127 = arith.constant 0 : index
    %325 = vector.load %arg9[%324, %c0_126, %c0_127] : memref<8x8x32xf32, #tpu.memory_space<vmem>>, vector<1x8x32xf32>
    %326 = vector.shape_cast %325 : vector<1x8x32xf32> to vector<8x32xf32>
    %327 = vector.shape_cast %323 : vector<8x32xf32> to vector<1x8x32xf32>
    tpu.vector_store %arg9[%324, %c0_126, %c0_127], %327 {strides = array<i32>} : memref<8x8x32xf32, #tpu.memory_space<vmem>>, vector<1x8x32xf32>,
    %c3_i32_128 = arith.constant 3 : i32
    %328 = arith.index_cast %c3_i32_128 : i32 to index
    %c0_129 = arith.constant 0 : index
    %c0_130 = arith.constant 0 : index
    %329 = vector.load %arg15[%328, %c0_129, %c0_130] : memref<8x8x128xf32, #tpu.memory_space<vmem>>, vector<1x8x128xf32>
    %330 = vector.shape_cast %329 : vector<1x8x128xf32> to vector<8x128xf32>
    %cst_131 = arith.constant dense<0.000000e+00> : vector<8x128xf32>
    %331 = tpu.matmul %323, %245, %cst_131 {dimension_numbers = #tpu.dot_dimension_numbers<[1], [0], [0], [1], [0, 0, 1, 1], [], []>} : vector<8x32xf32>, vector<32x128xf32>, vector<8x128xf32> -> vector<8x128xf32>
    %332 = arith.addf %330, %331 : vector<8x128xf32>
    %333 = arith.negf %332 : vector<8x128xf32>
    %334 = math.exp %333 : vector<8x128xf32>
    %cst_132 = arith.constant 1.000000e+00 : f32
    %335 = vector.broadcast %cst_132 : f32 to vector<8x128xf32>
    %336 = arith.addf %335, %334 : vector<8x128xf32>
    %337 = arith.divf %335, %336 : vector<8x128xf32>
    %338 = math.tanh %332 : vector<8x128xf32>
    %339 = vector.extract_strided_slice %337 {offsets = [0, 0], sizes = [8, 32], strides = [1, 1]} : vector<8x128xf32> to vector<8x32xf32>
    %340 = vector.extract_strided_slice %337 {offsets = [0, 32], sizes = [8, 32], strides = [1, 1]} : vector<8x128xf32> to vector<8x32xf32>
    %341 = vector.extract_strided_slice %338 {offsets = [0, 64], sizes = [8, 32], strides = [1, 1]} : vector<8x128xf32> to vector<8x32xf32>
    %342 = vector.extract_strided_slice %337 {offsets = [0, 96], sizes = [8, 32], strides = [1, 1]} : vector<8x128xf32> to vector<8x32xf32>
    %cst_133 = arith.constant 0.699999988 : f32
    %343 = vector.broadcast %cst_133 : f32 to vector<8x32xf32>
    %344 = arith.mulf %343, %321 : vector<8x32xf32>
    %345 = arith.mulf %340, %344 : vector<8x32xf32>
    %346 = arith.mulf %339, %341 : vector<8x32xf32>
    %347 = arith.addf %345, %346 : vector<8x32xf32>
    %348 = math.tanh %347 : vector<8x32xf32>
    %349 = arith.mulf %342, %348 : vector<8x32xf32>
    %350 = arith.index_cast %c3_i32_128 : i32 to index
    %c0_134 = arith.constant 0 : index
    %c0_135 = arith.constant 0 : index
    %351 = vector.load %arg9[%350, %c0_134, %c0_135] : memref<8x8x32xf32, #tpu.memory_space<vmem>>, vector<1x8x32xf32>
    %352 = vector.shape_cast %351 : vector<1x8x32xf32> to vector<8x32xf32>
    %353 = vector.shape_cast %349 : vector<8x32xf32> to vector<1x8x32xf32>
    tpu.vector_store %arg9[%350, %c0_134, %c0_135], %353 {strides = array<i32>} : memref<8x8x32xf32, #tpu.memory_space<vmem>>, vector<1x8x32xf32>,
    %c4_i32_136 = arith.constant 4 : i32
    %354 = arith.index_cast %c4_i32_136 : i32 to index
    %c0_137 = arith.constant 0 : index
    %c0_138 = arith.constant 0 : index
    %355 = vector.load %arg15[%354, %c0_137, %c0_138] : memref<8x8x128xf32, #tpu.memory_space<vmem>>, vector<1x8x128xf32>
    %356 = vector.shape_cast %355 : vector<1x8x128xf32> to vector<8x128xf32>
    %cst_139 = arith.constant dense<0.000000e+00> : vector<8x128xf32>
    %357 = tpu.matmul %349, %245, %cst_139 {dimension_numbers = #tpu.dot_dimension_numbers<[1], [0], [0], [1], [0, 0, 1, 1], [], []>} : vector<8x32xf32>, vector<32x128xf32>, vector<8x128xf32> -> vector<8x128xf32>
    %358 = arith.addf %356, %357 : vector<8x128xf32>
    %359 = arith.negf %358 : vector<8x128xf32>
    %360 = math.exp %359 : vector<8x128xf32>
    %cst_140 = arith.constant 1.000000e+00 : f32
    %361 = vector.broadcast %cst_140 : f32 to vector<8x128xf32>
    %362 = arith.addf %361, %360 : vector<8x128xf32>
    %363 = arith.divf %361, %362 : vector<8x128xf32>
    %364 = math.tanh %358 : vector<8x128xf32>
    %365 = vector.extract_strided_slice %363 {offsets = [0, 0], sizes = [8, 32], strides = [1, 1]} : vector<8x128xf32> to vector<8x32xf32>
    %366 = vector.extract_strided_slice %363 {offsets = [0, 32], sizes = [8, 32], strides = [1, 1]} : vector<8x128xf32> to vector<8x32xf32>
    %367 = vector.extract_strided_slice %364 {offsets = [0, 64], sizes = [8, 32], strides = [1, 1]} : vector<8x128xf32> to vector<8x32xf32>
    %368 = vector.extract_strided_slice %363 {offsets = [0, 96], sizes = [8, 32], strides = [1, 1]} : vector<8x128xf32> to vector<8x32xf32>
    %cst_141 = arith.constant 0.699999988 : f32
    %369 = vector.broadcast %cst_141 : f32 to vector<8x32xf32>
    %370 = arith.mulf %369, %347 : vector<8x32xf32>
    %371 = arith.mulf %366, %370 : vector<8x32xf32>
    %372 = arith.mulf %365, %367 : vector<8x32xf32>
    %373 = arith.addf %371, %372 : vector<8x32xf32>
    %374 = math.tanh %373 : vector<8x32xf32>
    %375 = arith.mulf %368, %374 : vector<8x32xf32>
    %376 = arith.index_cast %c4_i32_136 : i32 to index
    %c0_142 = arith.constant 0 : index
    %c0_143 = arith.constant 0 : index
    %377 = vector.load %arg9[%376, %c0_142, %c0_143] : memref<8x8x32xf32, #tpu.memory_space<vmem>>, vector<1x8x32xf32>
    %378 = vector.shape_cast %377 : vector<1x8x32xf32> to vector<8x32xf32>
    %379 = vector.shape_cast %375 : vector<8x32xf32> to vector<1x8x32xf32>
    tpu.vector_store %arg9[%376, %c0_142, %c0_143], %379 {strides = array<i32>} : memref<8x8x32xf32, #tpu.memory_space<vmem>>, vector<1x8x32xf32>,
    %c5_i32_144 = arith.constant 5 : i32
    %380 = arith.index_cast %c5_i32_144 : i32 to index
    %c0_145 = arith.constant 0 : index
    %c0_146 = arith.constant 0 : index
    %381 = vector.load %arg15[%380, %c0_145, %c0_146] : memref<8x8x128xf32, #tpu.memory_space<vmem>>, vector<1x8x128xf32>
    %382 = vector.shape_cast %381 : vector<1x8x128xf32> to vector<8x128xf32>
    %cst_147 = arith.constant dense<0.000000e+00> : vector<8x128xf32>
    %383 = tpu.matmul %375, %245, %cst_147 {dimension_numbers = #tpu.dot_dimension_numbers<[1], [0], [0], [1], [0, 0, 1, 1], [], []>} : vector<8x32xf32>, vector<32x128xf32>, vector<8x128xf32> -> vector<8x128xf32>
    %384 = arith.addf %382, %383 : vector<8x128xf32>
    %385 = arith.negf %384 : vector<8x128xf32>
    %386 = math.exp %385 : vector<8x128xf32>
    %cst_148 = arith.constant 1.000000e+00 : f32
    %387 = vector.broadcast %cst_148 : f32 to vector<8x128xf32>
    %388 = arith.addf %387, %386 : vector<8x128xf32>
    %389 = arith.divf %387, %388 : vector<8x128xf32>
    %390 = math.tanh %384 : vector<8x128xf32>
    %391 = vector.extract_strided_slice %389 {offsets = [0, 0], sizes = [8, 32], strides = [1, 1]} : vector<8x128xf32> to vector<8x32xf32>
    %392 = vector.extract_strided_slice %389 {offsets = [0, 32], sizes = [8, 32], strides = [1, 1]} : vector<8x128xf32> to vector<8x32xf32>
    %393 = vector.extract_strided_slice %390 {offsets = [0, 64], sizes = [8, 32], strides = [1, 1]} : vector<8x128xf32> to vector<8x32xf32>
    %394 = vector.extract_strided_slice %389 {offsets = [0, 96], sizes = [8, 32], strides = [1, 1]} : vector<8x128xf32> to vector<8x32xf32>
    %cst_149 = arith.constant 0.699999988 : f32
    %395 = vector.broadcast %cst_149 : f32 to vector<8x32xf32>
    %396 = arith.mulf %395, %373 : vector<8x32xf32>
    %397 = arith.mulf %392, %396 : vector<8x32xf32>
    %398 = arith.mulf %391, %393 : vector<8x32xf32>
    %399 = arith.addf %397, %398 : vector<8x32xf32>
    %400 = math.tanh %399 : vector<8x32xf32>
    %401 = arith.mulf %394, %400 : vector<8x32xf32>
    %402 = arith.index_cast %c5_i32_144 : i32 to index
    %c0_150 = arith.constant 0 : index
    %c0_151 = arith.constant 0 : index
    %403 = vector.load %arg9[%402, %c0_150, %c0_151] : memref<8x8x32xf32, #tpu.memory_space<vmem>>, vector<1x8x32xf32>
    %404 = vector.shape_cast %403 : vector<1x8x32xf32> to vector<8x32xf32>
    %405 = vector.shape_cast %401 : vector<8x32xf32> to vector<1x8x32xf32>
    tpu.vector_store %arg9[%402, %c0_150, %c0_151], %405 {strides = array<i32>} : memref<8x8x32xf32, #tpu.memory_space<vmem>>, vector<1x8x32xf32>,
    %c6_i32_152 = arith.constant 6 : i32
    %406 = arith.index_cast %c6_i32_152 : i32 to index
    %c0_153 = arith.constant 0 : index
    %c0_154 = arith.constant 0 : index
    %407 = vector.load %arg15[%406, %c0_153, %c0_154] : memref<8x8x128xf32, #tpu.memory_space<vmem>>, vector<1x8x128xf32>
    %408 = vector.shape_cast %407 : vector<1x8x128xf32> to vector<8x128xf32>
    %cst_155 = arith.constant dense<0.000000e+00> : vector<8x128xf32>
    %409 = tpu.matmul %401, %245, %cst_155 {dimension_numbers = #tpu.dot_dimension_numbers<[1], [0], [0], [1], [0, 0, 1, 1], [], []>} : vector<8x32xf32>, vector<32x128xf32>, vector<8x128xf32> -> vector<8x128xf32>
    %410 = arith.addf %408, %409 : vector<8x128xf32>
    %411 = arith.negf %410 : vector<8x128xf32>
    %412 = math.exp %411 : vector<8x128xf32>
    %cst_156 = arith.constant 1.000000e+00 : f32
    %413 = vector.broadcast %cst_156 : f32 to vector<8x128xf32>
    %414 = arith.addf %413, %412 : vector<8x128xf32>
    %415 = arith.divf %413, %414 : vector<8x128xf32>
    %416 = math.tanh %410 : vector<8x128xf32>
    %417 = vector.extract_strided_slice %415 {offsets = [0, 0], sizes = [8, 32], strides = [1, 1]} : vector<8x128xf32> to vector<8x32xf32>
    %418 = vector.extract_strided_slice %415 {offsets = [0, 32], sizes = [8, 32], strides = [1, 1]} : vector<8x128xf32> to vector<8x32xf32>
    %419 = vector.extract_strided_slice %416 {offsets = [0, 64], sizes = [8, 32], strides = [1, 1]} : vector<8x128xf32> to vector<8x32xf32>
    %420 = vector.extract_strided_slice %415 {offsets = [0, 96], sizes = [8, 32], strides = [1, 1]} : vector<8x128xf32> to vector<8x32xf32>
    %cst_157 = arith.constant 0.699999988 : f32
    %421 = vector.broadcast %cst_157 : f32 to vector<8x32xf32>
    %422 = arith.mulf %421, %399 : vector<8x32xf32>
    %423 = arith.mulf %418, %422 : vector<8x32xf32>
    %424 = arith.mulf %417, %419 : vector<8x32xf32>
    %425 = arith.addf %423, %424 : vector<8x32xf32>
    %426 = math.tanh %425 : vector<8x32xf32>
    %427 = arith.mulf %420, %426 : vector<8x32xf32>
    %428 = arith.index_cast %c6_i32_152 : i32 to index
    %c0_158 = arith.constant 0 : index
    %c0_159 = arith.constant 0 : index
    %429 = vector.load %arg9[%428, %c0_158, %c0_159] : memref<8x8x32xf32, #tpu.memory_space<vmem>>, vector<1x8x32xf32>
    %430 = vector.shape_cast %429 : vector<1x8x32xf32> to vector<8x32xf32>
    %431 = vector.shape_cast %427 : vector<8x32xf32> to vector<1x8x32xf32>
    tpu.vector_store %arg9[%428, %c0_158, %c0_159], %431 {strides = array<i32>} : memref<8x8x32xf32, #tpu.memory_space<vmem>>, vector<1x8x32xf32>,
    %c7_i32_160 = arith.constant 7 : i32
    %432 = arith.index_cast %c7_i32_160 : i32 to index
    %c0_161 = arith.constant 0 : index
    %c0_162 = arith.constant 0 : index
    %433 = vector.load %arg15[%432, %c0_161, %c0_162] : memref<8x8x128xf32, #tpu.memory_space<vmem>>, vector<1x8x128xf32>
    %434 = vector.shape_cast %433 : vector<1x8x128xf32> to vector<8x128xf32>
    %cst_163 = arith.constant dense<0.000000e+00> : vector<8x128xf32>
    %435 = tpu.matmul %427, %245, %cst_163 {dimension_numbers = #tpu.dot_dimension_numbers<[1], [0], [0], [1], [0, 0, 1, 1], [], []>} : vector<8x32xf32>, vector<32x128xf32>, vector<8x128xf32> -> vector<8x128xf32>
    %436 = arith.addf %434, %435 : vector<8x128xf32>
    %437 = arith.negf %436 : vector<8x128xf32>
    %438 = math.exp %437 : vector<8x128xf32>
    %cst_164 = arith.constant 1.000000e+00 : f32
    %439 = vector.broadcast %cst_164 : f32 to vector<8x128xf32>
    %440 = arith.addf %439, %438 : vector<8x128xf32>
    %441 = arith.divf %439, %440 : vector<8x128xf32>
    %442 = math.tanh %436 : vector<8x128xf32>
    %443 = vector.extract_strided_slice %441 {offsets = [0, 0], sizes = [8, 32], strides = [1, 1]} : vector<8x128xf32> to vector<8x32xf32>
    %444 = vector.extract_strided_slice %441 {offsets = [0, 32], sizes = [8, 32], strides = [1, 1]} : vector<8x128xf32> to vector<8x32xf32>
    %445 = vector.extract_strided_slice %442 {offsets = [0, 64], sizes = [8, 32], strides = [1, 1]} : vector<8x128xf32> to vector<8x32xf32>
    %446 = vector.extract_strided_slice %441 {offsets = [0, 96], sizes = [8, 32], strides = [1, 1]} : vector<8x128xf32> to vector<8x32xf32>
    %cst_165 = arith.constant 0.699999988 : f32
    %447 = vector.broadcast %cst_165 : f32 to vector<8x32xf32>
    %448 = arith.mulf %447, %425 : vector<8x32xf32>
    %449 = arith.mulf %444, %448 : vector<8x32xf32>
    %450 = arith.mulf %443, %445 : vector<8x32xf32>
    %451 = arith.addf %449, %450 : vector<8x32xf32>
    %452 = math.tanh %451 : vector<8x32xf32>
    %453 = arith.mulf %446, %452 : vector<8x32xf32>
    %454 = arith.index_cast %c7_i32_160 : i32 to index
    %c0_166 = arith.constant 0 : index
    %c0_167 = arith.constant 0 : index
    %455 = vector.load %arg9[%454, %c0_166, %c0_167] : memref<8x8x32xf32, #tpu.memory_space<vmem>>, vector<1x8x32xf32>
    %456 = vector.shape_cast %455 : vector<1x8x32xf32> to vector<8x32xf32>
    %457 = vector.shape_cast %453 : vector<8x32xf32> to vector<1x8x32xf32>
    tpu.vector_store %arg9[%454, %c0_166, %c0_167], %457 {strides = array<i32>} : memref<8x8x32xf32, #tpu.memory_space<vmem>>, vector<1x8x32xf32>,
    %c8_i32_168 = arith.constant 8 : i32
    %c1_169 = arith.constant 1 : index
    %c0_170 = arith.constant 0 : index
    %c0_171 = arith.constant 0 : index
    %458 = vector.load %arg12[%c1_169, %c0_170, %c0_171] : memref<2x8x32xf32, #tpu.memory_space<vmem>>, vector<1x8x32xf32>
    %459 = vector.shape_cast %458 : vector<1x8x32xf32> to vector<8x32xf32>
    %460 = vector.shape_cast %453 : vector<8x32xf32> to vector<1x8x32xf32>
    tpu.vector_store %arg12[%c1_169, %c0_170, %c0_171], %460 {strides = array<i32>} : memref<2x8x32xf32, #tpu.memory_space<vmem>>, vector<1x8x32xf32>,
    %c1_172 = arith.constant 1 : index
    %c0_173 = arith.constant 0 : index
    %c0_174 = arith.constant 0 : index
    %461 = vector.load %arg13[%c1_172, %c0_173, %c0_174] : memref<2x8x32xf32, #tpu.memory_space<vmem>>, vector<1x8x32xf32>
    %462 = vector.shape_cast %461 : vector<1x8x32xf32> to vector<8x32xf32>
    %463 = vector.shape_cast %451 : vector<8x32xf32> to vector<1x8x32xf32>
    tpu.vector_store %arg13[%c1_172, %c0_173, %c0_174], %463 {strides = array<i32>} : memref<2x8x32xf32, #tpu.memory_space<vmem>>, vector<1x8x32xf32>,
    %c0_i32_175 = arith.constant 0 : i32
    %464 = arith.cmpi eq, %arg1, %c0_i32_175 : i32
    %465 = arith.extui %464 : i1 to i32
    %c0_i32_176 = arith.constant 0 : i32
    %466 = arith.cmpi ne, %465, %c0_i32_176 : i32
    scf.if %466 {
      %c0_177 = arith.constant 0 : index
      %c0_178 = arith.constant 0 : index
      %c0_179 = arith.constant 0 : index
      %467 = vector.load %arg12[%c0_177, %c0_178, %c0_179] : memref<2x8x32xf32, #tpu.memory_space<vmem>>, vector<2x8x32xf32>
      %c0_180 = arith.constant 0 : index
      %c0_181 = arith.constant 0 : index
      %c0_182 = arith.constant 0 : index
      %468 = vector.load %arg10[%c0_180, %c0_181, %c0_182] : memref<2x8x32xf32, #tpu.memory_space<vmem>>, vector<2x8x32xf32>
      tpu.vector_store %arg10[%c0_180, %c0_181, %c0_182], %467 {strides = array<i32>} : memref<2x8x32xf32, #tpu.memory_space<vmem>>, vector<2x8x32xf32>,
      %c0_183 = arith.constant 0 : index
      %c0_184 = arith.constant 0 : index
      %c0_185 = arith.constant 0 : index
      %469 = vector.load %arg13[%c0_183, %c0_184, %c0_185] : memref<2x8x32xf32, #tpu.memory_space<vmem>>, vector<2x8x32xf32>
      %c0_186 = arith.constant 0 : index
      %c0_187 = arith.constant 0 : index
      %c0_188 = arith.constant 0 : index
      %470 = vector.load %arg11[%c0_186, %c0_187, %c0_188] : memref<2x8x32xf32, #tpu.memory_space<vmem>>, vector<2x8x32xf32>
      tpu.vector_store %arg11[%c0_186, %c0_187, %c0_188], %469 {strides = array<i32>} : memref<2x8x32xf32, #tpu.memory_space<vmem>>, vector<2x8x32xf32>,
    } else {
    }
    return
  }
  func.func @transform_0(%arg0: i32, %arg1: i32) -> (i32, i32, i32) {
    %c0_i32 = arith.constant 0 : i32
    %c0_i32_0 = arith.constant 0 : i32
    return %arg1, %arg0, %c0_i32 : i32, i32, i32
  }
  func.func @transform_1(%arg0: i32, %arg1: i32) -> (i32, i32, i32) {
    %c0_i32 = arith.constant 0 : i32
    %c0_i32_0 = arith.constant 0 : i32
    %c0_i32_1 = arith.constant 0 : i32
    return %c0_i32, %arg0, %c0_i32_0 : i32, i32, i32
  }
  func.func @transform_2(%arg0: i32, %arg1: i32) -> (i32, i32, i32) {
    %c0_i32 = arith.constant 0 : i32
    %c0_i32_0 = arith.constant 0 : i32
    %c0_i32_1 = arith.constant 0 : i32
    return %c0_i32, %arg0, %c0_i32_0 : i32, i32, i32
  }
  func.func @transform_3(%arg0: i32, %arg1: i32) -> (i32, i32) {
    %c0_i32 = arith.constant 0 : i32
    %c0_i32_0 = arith.constant 0 : i32
    %c0_i32_1 = arith.constant 0 : i32
    return %c0_i32, %c0_i32_0 : i32, i32
  }
  func.func @transform_4(%arg0: i32, %arg1: i32) -> (i32, i32, i32) {
    %c0_i32 = arith.constant 0 : i32
    %c0_i32_0 = arith.constant 0 : i32
    %c0_i32_1 = arith.constant 0 : i32
    %c0_i32_2 = arith.constant 0 : i32
    return %c0_i32, %c0_i32_0, %c0_i32_1 : i32, i32, i32
  }
  func.func @transform_5(%arg0: i32, %arg1: i32) -> (i32, i32, i32) {
    %c0_i32 = arith.constant 0 : i32
    %c0_i32_0 = arith.constant 0 : i32
    %c0_i32_1 = arith.constant 0 : i32
    %c0_i32_2 = arith.constant 0 : i32
    return %c0_i32, %c0_i32_0, %c0_i32_1 : i32, i32, i32
  }
  func.func @transform_6(%arg0: i32, %arg1: i32) -> (i32, i32, i32) {
    %c0_i32 = arith.constant 0 : i32
    %c0_i32_0 = arith.constant 0 : i32
    %c0_i32_1 = arith.constant 0 : i32
    %c0_i32_2 = arith.constant 0 : i32
    return %c0_i32, %c0_i32_0, %c0_i32_1 : i32, i32, i32
  }
  func.func @transform_7(%arg0: i32, %arg1: i32) -> (i32, i32, i32) {
    %c0_i32 = arith.constant 0 : i32
    %c0_i32_0 = arith.constant 0 : i32
    return %arg1, %arg0, %c0_i32 : i32, i32, i32
  }
  func.func @transform_8(%arg0: i32, %arg1: i32) -> (i32, i32, i32) {
    %c0_i32 = arith.constant 0 : i32
    %c0_i32_0 = arith.constant 0 : i32
    %c0_i32_1 = arith.constant 0 : i32
    return %c0_i32, %arg0, %c0_i32_0 : i32, i32, i32
  }
  func.func @transform_9(%arg0: i32, %arg1: i32) -> (i32, i32, i32) {
    %c0_i32 = arith.constant 0 : i32
    %c0_i32_0 = arith.constant 0 : i32
    %c0_i32_1 = arith.constant 0 : i32
    return %c0_i32, %arg0, %c0_i32_0 : i32, i32, i32
  }
}

</mosaic_0001>

<bundles_post_ra>
// kernel: tpu_custom_call.1
= control target key start
LH: loop header
LB: loop body
LE: loop exit
PB: predicated region body
PF: predicated region fallthrough
CT: control target
= control target key end

     0   :  { %15 = vsyncpa [#allocation7], 0  ;;  %s2312_s0 = inlined_call_operand.hbm [shape: f32[8,8,16], index: 0, kind: input, shape index: {}]   ;;  %s2313_s1 = inlined_call_operand.hbm [shape: f32[2,8,32], index: 1, kind: input, shape index: {}]   ;;  %s2314_s2 = inlined_call_operand.hbm [shape: f32[2,8,32], index: 2, kind: input, shape index: {}]   ;;  %s2315_s3 = inlined_call_operand.hbm [shape: f32[16,128], index: 3, kind: input, shape index: {}]   ;;  %s2316_s4 = inlined_call_operand.hbm [shape: f32[2,32,128], index: 4, kind: input, shape index: {}]   ;;  %s2317_s5 = inlined_call_operand.hbm [shape: f32[1,32,128], index: 5, kind: input, shape index: {}]   ;;  %s2318_s6 = inlined_call_operand.vmem [shape: f32[2,1,128], index: 6, kind: input, shape index: {}]   ;;  %s2319_s7 = inlined_call_operand.hbm [shape: f32[8,8,32], index: 7, kind: output, shape index: {0}]   ;;  %s2320_s8 = inlined_call_operand.hbm [shape: f32[2,8,32], index: 8, kind: output, shape index: {1}]   ;;  %s2321_s9 = inlined_call_operand.hbm [shape: f32[2,8,32], index: 9, kind: output, shape index: {2}]  }
   0x1   :  { %16 = vsyncpa [#allocation10], 0 }
   0x2   :  { %17 = vsyncpa [#allocation13], 0 }
   0x3   :  { %18 = vsyncpa [#allocation16], 0 }
   0x4   :  { %19 = vsyncpa [#allocation8], 0 }
   0x5   :  { %20 = vsyncpa [#allocation19], 0  ;;  %s38_s11 = sshll.u32 %s2313_s1, 4  ;;  %s1937_s12 = smov [#allocation9]   ;;  %s39_s11 = int_to_ptr.hbm [resolvable:$true] %s38_s11 }
   0x6   :  { %s40_s13 = sshll.u32 %s1937_s12, 4  ;;  %s64_s16 = sshll.u32 %s2315_s3, 4  ;;  %s41_s13 = int_to_ptr.vmem [resolvable:$true] %s40_s13  ;;  %s65_s16 = int_to_ptr.hbm [resolvable:$true] %s64_s16 }
   0x7   :  { %s1938_s17 = smov 128   ;;  %s1939_s18 = smov 8  }
   0x8   :  { %46 = dma.hbm_to_vmem [thread:$0]  %s39_s11, 256, %s41_s13, [#allocation10], %s1938_s17, %s1938_s17, %s1939_s18  }
   0x9   :  { %s1940_s19 = smov [#allocation12]   ;;  %s25_s1 = sshll.u32 %s2312_s0, 4  ;;  %s26_s1 = int_to_ptr.hbm [resolvable:$true] %s25_s1 }
   0xa   :  { %s66_s20 = sshll.u32 %s1940_s19, 4  ;;  %s51_s24 = sshll.u32 %s2314_s2, 4  ;;  %s67_s20 = int_to_ptr.vmem [resolvable:$true] %s66_s20  ;;  %s52_s24 = int_to_ptr.hbm [resolvable:$true] %s51_s24 }
   0xb   :  { %72 = dma.hbm_to_vmem [thread:$0]  %s65_s16, 256, %s67_s20, [#allocation13], %s1938_s17, %s1938_s17, %s1939_s18  }
   0xc   :  { %s1941_s25 = smov [#allocation6]   ;;  %s1942_s27 = smov [#allocation11]  }
   0xd   :  { %s27_s26 = sshll.u32 %s1941_s25, 4  ;;  %s53_s0 = sshll.u32 %s1942_s27, 4  ;;  %s28_s26 = int_to_ptr.vmem [resolvable:$true] %s27_s26  ;;  %s54_s0 = int_to_ptr.vmem [resolvable:$true] %s53_s0 }
   0xe   :  { %33 = dma.hbm_to_vmem [thread:$0]  %s26_s1, 1024, %s28_s26, [#allocation7], %s1938_s17, %s1938_s17, %s1939_s18  }
   0xf   :  { %s77_s30 = sshll.u32 %s2316_s4, 4  ;;  %s90_s11 = sshll.u32 %s2317_s5, 4  ;;  %s78_s30 = int_to_ptr.hbm [resolvable:$true] %s77_s30  ;;  %s91_s11 = int_to_ptr.hbm [resolvable:$true] %s90_s11 }
  0x10   :  { %59 = dma.hbm_to_vmem [thread:$0]  %s52_s24, 256, %s54_s0, [#allocation10], %s1938_s17, %s1938_s17, %s1939_s18  }
  0x11   :  { %s1943_s12 = smov [#allocation14]   ;;  %s1944_s14 = smov [#allocation15]  }
  0x12   :  { %s79_s13 = sshll.u32 %s1943_s12, 4  ;;  %s92_s4 = sshll.u32 %s1944_s14, 4  ;;  %s80_s13 = int_to_ptr.vmem [resolvable:$true] %s79_s13  ;;  %s93_s4 = int_to_ptr.vmem [resolvable:$true] %s92_s4 }
  0x13   :  { %85 = dma.hbm_to_vmem [thread:$0]  %s78_s30, 1024, %s80_s13, [#allocation13], %s1938_s17, %s1938_s17, %s1939_s18  }
  0x14   :  { %98 = dma.hbm_to_vmem [thread:$0]  %s91_s11, 512, %s93_s4, [#allocation16], %s1938_s17, %s1938_s17, %s1939_s18  }
  0x15   :  { %1925 = dma.done.wait [#allocation7], 1024  }
  0x16   :  { %1926 = vsyncadd [#allocation7], 4294966272 }
  0x17   :  { %1927 = dma.done.wait [#allocation10], 512  }
  0x18   :  { %1928 = vsyncadd [#allocation10], 4294966784 }
  0x19   :  { %1929 = dma.done.wait [#allocation13], 1280  }
  0x1a   :  { %1930 = vsyncadd [#allocation13], 4294966016 }
  0x1b   :  { %1931 = dma.done.wait [#allocation16], 512  }
  0x1c   :  { %1932 = vsyncadd [#allocation16], 4294966784  ;;  %v2037_v0 = vld [vmem:[#allocation14 + $0x18] sm:$0xff]  ;;  %v2039_v2 = vld [vmem:[#allocation14 + $0x10] sm:$0xff]  ;;  %vm131_vm0 = vcmask 261120   ;;  %vm152_vm1 = vcmask 130048  }
  0x1d   :  { %v139_v1 = vld [vmem:[#allocation12 + $0x8] sm:$0xff]  ;;  %249 = vmatpush.msra.mxu1 %v2037_v0  ;;  %v138_v3 = vld [vmem:[#allocation12] sm:$0xff]  ;;  %v2042_v5 = vld [vmem:[#allocation14 + $0x8] sm:$0xff]  ;;  %321 = vmatpush.msra.mxu2 %v2037_v0  ;;  %s1945_s16 = smov 64   ;;  %s1946_s19 = smov 32  }
  0x1e   :  { %191 = vmatpush.msra.mxu0 %v139_v1  ;;  %v140_v4 = vld [vmem:[#allocation6] sm:$0xff]  ;;  %v2048_v7 = vld [vmem:[#allocation14] sm:$0xff]  ;;  %v797_v40 = vld [vmem:[#allocation15 + $0x18] sm:$0xff]  ;;  %s1948_s3 = smov [#allocation17]   ;;  %s1464_s26 = sshll.u32 %s2319_s7, 4  ;;  %s1465_s26 = int_to_ptr.hbm [resolvable:$true] %s1464_s26 }
  0x1f   :  { %v129_v6 = vld [vmem:[#allocation9] sm:$0xff]  ;;  %250 = vmatpush.msra.mxu1 %v2039_v2  ;;  %322 = vmatpush.msra.mxu2 %v2039_v2  ;;  %v134_v9 = vld [vmem:[#allocation11] sm:$0xff]  ;;  %v141_v42 = vld [vmem:[#allocation6 + $0x8] sm:$0xff]  ;;  %s1462_s23 = sshll.u32 %s1948_s3, 4  ;;  %s1949_s27 = smov [#allocation18]   ;;  %s1463_s23 = int_to_ptr.vmem [resolvable:$true] %s1462_s23 }
  0x20   :  { %192 = vmatpush.msra.mxu0 %v138_v3  ;;  %132 = vst.msk [vmem:[#allocation2] sm:$0xff] %vm131_vm0, %v129_v6  ;;  %v2072_v10 = vld [vmem:[%s2318_s6] ss:$0 sm:$0xff]  ;;  %847 = vmatpush.msra.mxu3 %v797_v40  ;;  %v795_v43 = vld [vmem:[#allocation15 + $0x8] sm:$0xff]  ;;  %v794_v44 = vld [vmem:[#allocation15] sm:$0xff]  ;;  %s1475_s0 = sshll.u32 %s1949_s27, 4  ;;  %s1476_s0 = int_to_ptr.vmem [resolvable:$true] %s1475_s0 }
  0x21   :  { %1515 = vmatmul.msk.f32.vlgmr.msra.gmra.mxu0 %vm152_vm1, %v140_v4  ;;  %251 = vmatpush.msra.mxu1 %v2042_v5  ;;  %136 = vst.msk [vmem:[#allocation3] sm:$0xff] %vm131_vm0, %v134_v9  ;;  %v796_v41 = vld [vmem:[#allocation15 + $0x10] sm:$0xff]  ;;  %s1477_s30 = sshll.u32 %s2320_s8, 4  ;;  %s1950_s2 = smov [#allocation20]   ;;  %s1478_s30 = int_to_ptr.hbm [resolvable:$true] %s1477_s30 }
  0x22   :  { %323 = vmatpush.msra.mxu2 %v2042_v5  ;;  %848 = vmatpush.msra.mxu3 %v796_v41  ;;  %s1488_s10 = sshll.u32 %s1950_s2, 4  ;;  %s1490_s12 = sshll.u32 %s2321_s9, 4  ;;  %s1489_s10 = int_to_ptr.vmem [resolvable:$true] %s1488_s10  ;;  %s1491_s12 = int_to_ptr.hbm [resolvable:$true] %s1490_s12 }
  0x23   :  { %252 = vmatpush.msra.mxu1 %v2048_v7 }
  0x24   :  { %324 = vmatpush.msra.mxu2 %v2048_v7  ;;  %849 = vmatpush.msra.mxu3 %v795_v43  ;;  %v143_v43 = vld [vmem:[#allocation6 + $0x18] sm:$0xff] }
  0x25   :  { %390 = vmatpush.msrb.mxu1 %v2037_v0 }
  0x26   :  { %528 = vmatpush.msrb.mxu2 %v2037_v0  ;;  %850 = vmatpush.msra.mxu3 %v794_v44 }
  0x27   :  { %v230_v8 = vld [vmem:[#allocation2] sm:$0xff]  ;;  %391 = vmatpush.msrb.mxu1 %v2039_v2 }
  0x28   :  { %1523 = vmatmul.msk.f32.vlgmr.msra.gmra.mxu1 %vm131_vm0, %v230_v8  ;;  %529 = vmatpush.msrb.mxu2 %v2039_v2  ;;  %v231_v16 = vld [vmem:[#allocation3] sm:$0xff] }
  0x29   :  { %392 = vmatpush.msrb.mxu1 %v2042_v5  ;;  %v278_v17 = vmul.f32 0.7, %v231_v16  ;;  %1516 = vmatmul.msk.f32.gmra.mxu0 %vm152_vm1, %v141_v42 }
  0x2a   :  { %530 = vmatpush.msrb.mxu2 %v2042_v5 }
  0x2b   :  { %393 = vmatpush.msrb.mxu1 %v2048_v7 }
  0x2c   :  { %531 = vmatpush.msrb.mxu2 %v2048_v7 }
  0x2d   :  { %459 = vmatpush.msra.mxu1 %v2037_v0 }
  0x2f   :  { %460 = vmatpush.msra.mxu1 %v2039_v2 }
  0x31   :  { %461 = vmatpush.msra.mxu1 %v2042_v5 }
  0x33   :  { %462 = vmatpush.msra.mxu1 %v2048_v7 }
  0x9e   :  { %v194_v11 = vpop.f32.mrf.mxu0 }
  0x9f   :  { %v195_v12 = vadd.f32 %v2072_v10, %v194_v11 }
  0xa5   :  { %v254_v13 = vpop.f32.mrf.mxu1 }
  0xa6   :  { %v257_v14 = vadd.f32 %v254_v13, %v195_v12  ;;  %v197_v47 = vpop.f32.mrf.mxu0  ;;  %v142_v13 = vld [vmem:[#allocation6 + $0x10] sm:$0xff] }
  0xa7   :  { %v198_v48 = vadd.f32 %v2072_v10, %v197_v47  ;;  %1517 = vmatmul.msk.f32.gmra.mxu0 %vm152_vm1, %v142_v13 }
  0xa8   :  { %1580 = vtanh.f32 %v257_v14  ;;  %v1524_v18 = vmul.f32 -1.442695, %v257_v14 }
  0xaa   :  { %1582 = vpow2.f32 %v1524_v18 }
  0xae   :  { %v1581_v15 = vpop.eup %1580 }
  0xaf   :  { %285 = vrot.lane.b32.xlu0 %v1581_v15, %s1945_s16  ;;  %1518 = vmatmul.msk.f32.gmra.mxu0 %vm152_vm1, %v143_v43 }
  0xb0   :  { %v1583_v19 = vpop.eup %1582 }
  0xb1   :  { %v261_v20 = vadd.f32 1.0, %v1583_v19 }
  0xb3   :  { %1584 = vrcp.f32 %v261_v20  ;;  %v273_v26 = vand.u32 2147483648, %v261_v20  ;;  %vm267_vm3 = vweird.f32 %v261_v20  ;;  %v271_v27 = vand.u32 2147483647, %v261_v20 }
  0xb5   :  { %v274_v29 = vor.u32 1.1754944e-38, %v273_v26  ;;  %vm272_vm5 = vcmp.eq.f32.partialorder %v271_v27, 8.507059e+37 }
  0xb7   :  { %280 = vrot.lane.b32.xlu0 %v278_v17, %s1946_s19 }
  0xb9   :  { %v1585_v21 = vpop.eup %1584 }
  0xba   :  { %v263_v22 = vmul.f32 %v1585_v21, %v261_v20  ;;  %vm268_vm2 = vweird.f32 %v1585_v21 }
  0xbb   :  { %vm269_vm4 = vmor %vm267_vm3, %vm268_vm2 }
  0xbc   :  { %v264_v23 = vsub.f32 1.0, %v263_v22 }
  0xbe   :  { %v265_v24 = vmul.f32 %v1585_v21, %v264_v23 }
  0xc0   :  { %v266_v25 = vadd.f32 %v1585_v21, %v265_v24 }
  0xc2   :  { %v270_v28 = vsel %vm269_vm4, %v1585_v21, %v266_v25 }
  0xc3   :  { %v275_v31 = vsel %vm272_vm5, %v274_v29, %v270_v28 }
 0x121   :  { %v286_v30 = vpop.permute.xlu0 %285 }
 0x122   :  { %v288_v32 = vmul.f32 %v286_v30, %v275_v31 }
 0x124   :  { %290 = vrot.lane.b32.xlu1 %v288_v32, %s1946_s19  ;;  %v200_v18 = vpop.f32.mrf.mxu0 }
 0x125   :  { %v201_v19 = vadd.f32 %v2072_v10, %v200_v18 }
 0x129   :  { %v281_v33 = vpop.permute.xlu0 %280 }
 0x12a   :  { %v283_v34 = vmul.f32 %v281_v33, %v275_v31 }
 0x196   :  { %v291_v35 = vpop.permute.xlu1 %290 }
 0x197   :  { %v293_v36 = vadd.f32 %v291_v35, %v283_v34 }
 0x199   :  { %1586 = vtanh.f32 %v293_v36  ;;  %v350_v6 = vmul.f32 0.7, %v293_v36 }
 0x19f   :  { %v1587_v37 = vpop.eup %1586 }
 0x1a0   :  { %296 = vrot.lane.b32.xlu1 %v1587_v37, %s1945_s16 }
 0x212   :  { %v297_v38 = vpop.permute.xlu1 %296 }
 0x213   :  { %v299_v39 = vmul.f32 %v297_v38, %v275_v31 }
 0x215   :  { %301 = vrot.lane.b32.xlu2 %v299_v39, %s1946_s19 }
 0x26f   :  { %v302_v45 = vpop.permute.xlu2 %301 }
 0x270   :  { %304 = vst.msk [vmem:[#allocation4] sm:$0xff] %vm131_vm0, %v302_v45  ;;  %1525 = vmatmul.msk.f32.vlgmr.msra.gmra.mxu2 %vm131_vm0, %v302_v45 }
 0x271   :  { %597 = vmatpush.msra.mxu2 %v2037_v0 }
 0x273   :  { %598 = vmatpush.msra.mxu2 %v2039_v2 }
 0x275   :  { %599 = vmatpush.msra.mxu2 %v2042_v5 }
 0x277   :  { %v798_v46 = vld [vmem:[#allocation4] sm:$0xff]  ;;  %600 = vmatpush.msra.mxu2 %v2048_v7 }
 0x278   :  { %1540 = vmatmul.msk.f32.vlgmr.msra.gmra.mxu3 %vm131_vm0, %v798_v46 }
 0x2f3   :  { %v326_v49 = vpop.f32.mrf.mxu2 }
 0x2f4   :  { %v329_v50 = vadd.f32 %v326_v49, %v198_v48  ;;  %v203_v48 = vpop.f32.mrf.mxu0 }
 0x2f5   :  { %v204_v49 = vadd.f32 %v2072_v10, %v203_v48 }
 0x2f6   :  { %1588 = vtanh.f32 %v329_v50  ;;  %v1526_v52 = vmul.f32 -1.442695, %v329_v50 }
 0x2f8   :  { %1590 = vpow2.f32 %v1526_v52 }
 0x2fc   :  { %v1589_v51 = vpop.eup %1588 }
 0x2fd   :  { %353 = vrot.lane.b32.xlu2 %v1589_v51, %s1945_s16 }
 0x2fe   :  { %v1591_v53 = vpop.eup %1590 }
 0x2ff   :  { %v333_v54 = vadd.f32 1.0, %v1591_v53 }
 0x301   :  { %1592 = vrcp.f32 %v333_v54  ;;  %v345_v60 = vand.u32 2147483648, %v333_v54  ;;  %vm339_vm7 = vweird.f32 %v333_v54  ;;  %v343_v61 = vand.u32 2147483647, %v333_v54 }
 0x303   :  { %v346_v63 = vor.u32 1.1754944e-38, %v345_v60  ;;  %vm344_vm9 = vcmp.eq.f32.partialorder %v343_v61, 8.507059e+37 }
 0x307   :  { %v1593_v55 = vpop.eup %1592 }
 0x308   :  { %v335_v56 = vmul.f32 %v1593_v55, %v333_v54  ;;  %vm340_vm6 = vweird.f32 %v1593_v55 }
 0x309   :  { %vm341_vm8 = vmor %vm339_vm7, %vm340_vm6 }
 0x30a   :  { %v336_v57 = vsub.f32 1.0, %v335_v56 }
 0x30c   :  { %v337_v58 = vmul.f32 %v1593_v55, %v336_v57 }
 0x30e   :  { %v338_v59 = vadd.f32 %v1593_v55, %v337_v58 }
 0x310   :  { %v342_v62 = vsel %vm341_vm8, %v1593_v55, %v338_v59 }
 0x311   :  { %v347_v3 = vsel %vm344_vm9, %v346_v63, %v342_v62 }
 0x312   :  { %v351_v8 = vmul.f32 %v350_v6, %v347_v3 }
 0x357   :  { %v354_v1 = vpop.permute.xlu2 %353 }
 0x358   :  { %v356_v4 = vmul.f32 %v354_v1, %v347_v3 }
 0x35a   :  { %358 = vrot.lane.b32.xlu0 %v356_v4, %s1946_s19 }
 0x3cc   :  { %v359_v9 = vpop.permute.xlu0 %358 }
 0x3cd   :  { %v361_v11 = vadd.f32 %v359_v9, %v351_v8 }
 0x3cf   :  { %1594 = vtanh.f32 %v361_v11  ;;  %v419_v38 = vmul.f32 0.7, %v361_v11 }
 0x3d5   :  { %v1595_v12 = vpop.eup %1594 }
 0x3d6   :  { %364 = vrot.lane.b32.xlu1 %v1595_v12, %s1945_s16 }
 0x448   :  { %v365_v14 = vpop.permute.xlu1 %364 }
 0x449   :  { %v367_v15 = vmul.f32 %v365_v14, %v347_v3 }
 0x44b   :  { %369 = vrot.lane.b32.xlu2 %v367_v15, %s1946_s19 }
 0x4a5   :  { %v370_v16 = vpop.permute.xlu2 %369 }
 0x4a6   :  { %373 = vst.msk [vmem:[#allocation4 + $0x8] sm:$0xff] %vm131_vm0, %v370_v16  ;;  %1527 = vmatmul.msk.f32.vlgmr.msrb.gmra.mxu1 %vm131_vm0, %v370_v16  ;;  %v144_v16 = vld [vmem:[#allocation6 + $0x20] sm:$0xff] }
 0x4a7   :  { %666 = vmatpush.msrb.mxu1 %v2037_v0  ;;  %1519 = vmatmul.msk.f32.gmra.mxu0 %vm152_vm1, %v144_v16  ;;  %v2143_v16 = vld [vmem:[#allocation14 + $0x30] sm:$0xff] }
 0x4a9   :  { %667 = vmatpush.msrb.mxu1 %v2039_v2 }
 0x4ab   :  { %668 = vmatpush.msrb.mxu1 %v2042_v5 }
 0x4ad   :  { %v799_v17 = vld [vmem:[#allocation4 + $0x8] sm:$0xff]  ;;  %669 = vmatpush.msrb.mxu1 %v2048_v7 }
 0x4ae   :  { %1541 = vmatmul.msk.f32.gmra.mxu3 %vm131_vm0, %v799_v17 }
 0x523   :  { %v395_v20 = vpop.f32.mrf.mxu1 }
 0x524   :  { %v398_v21 = vadd.f32 %v395_v20, %v201_v19  ;;  %v206_v19 = vpop.f32.mrf.mxu0 }
 0x525   :  { %v207_v20 = vadd.f32 %v2072_v10, %v206_v19 }
 0x526   :  { %1596 = vtanh.f32 %v398_v21  ;;  %v1528_v23 = vmul.f32 -1.442695, %v398_v21 }
 0x528   :  { %1598 = vpow2.f32 %v1528_v23 }
 0x52c   :  { %v1597_v22 = vpop.eup %1596 }
 0x52d   :  { %422 = vrot.lane.b32.xlu0 %v1597_v22, %s1945_s16 }
 0x52e   :  { %v1599_v24 = vpop.eup %1598 }
 0x52f   :  { %v402_v25 = vadd.f32 1.0, %v1599_v24 }
 0x531   :  { %1600 = vrcp.f32 %v402_v25  ;;  %v414_v31 = vand.u32 2147483648, %v402_v25  ;;  %vm408_vm11 = vweird.f32 %v402_v25  ;;  %v412_v32 = vand.u32 2147483647, %v402_v25 }
 0x533   :  { %v415_v34 = vor.u32 1.1754944e-38, %v414_v31  ;;  %vm413_vm13 = vcmp.eq.f32.partialorder %v412_v32, 8.507059e+37 }
 0x537   :  { %v1601_v26 = vpop.eup %1600 }
 0x538   :  { %v404_v27 = vmul.f32 %v1601_v26, %v402_v25  ;;  %vm409_vm10 = vweird.f32 %v1601_v26 }
 0x539   :  { %vm410_vm12 = vmor %vm408_vm11, %vm409_vm10 }
 0x53a   :  { %v405_v28 = vsub.f32 1.0, %v404_v27 }
 0x53c   :  { %v406_v29 = vmul.f32 %v1601_v26, %v405_v28 }
 0x53e   :  { %v407_v30 = vadd.f32 %v1601_v26, %v406_v29 }
 0x540   :  { %v411_v33 = vsel %vm410_vm12, %v1601_v26, %v407_v30 }
 0x541   :  { %v416_v36 = vsel %vm413_vm13, %v415_v34, %v411_v33 }
 0x542   :  { %v420_v39 = vmul.f32 %v419_v38, %v416_v36 }
 0x59f   :  { %v423_v35 = vpop.permute.xlu0 %422 }
 0x5a0   :  { %v425_v37 = vmul.f32 %v423_v35, %v416_v36 }
 0x5a2   :  { %427 = vrot.lane.b32.xlu1 %v425_v37, %s1946_s19 }
 0x614   :  { %v428_v40 = vpop.permute.xlu1 %427 }
 0x615   :  { %v430_v41 = vadd.f32 %v428_v40, %v420_v39 }
 0x617   :  { %1602 = vtanh.f32 %v430_v41  ;;  %v488_v8 = vmul.f32 0.7, %v430_v41 }
 0x61d   :  { %v1603_v42 = vpop.eup %1602 }
 0x61e   :  { %433 = vrot.lane.b32.xlu2 %v1603_v42, %s1945_s16  ;;  %v145_v42 = vld [vmem:[#allocation6 + $0x28] sm:$0xff] }
 0x61f   :  { %1520 = vmatmul.msk.f32.gmra.mxu0 %vm152_vm1, %v145_v42 }
 0x678   :  { %v434_v44 = vpop.permute.xlu2 %433 }
 0x679   :  { %v436_v45 = vmul.f32 %v434_v44, %v416_v36 }
 0x67b   :  { %438 = vrot.lane.b32.xlu0 %v436_v45, %s1946_s19 }
 0x69c   :  { %v209_v45 = vpop.f32.mrf.mxu0 }
 0x6ed   :  { %v439_v46 = vpop.permute.xlu0 %438 }
 0x6ee   :  { %442 = vst.msk [vmem:[#allocation4 + $0x10] sm:$0xff] %vm131_vm0, %v439_v46  ;;  %1529 = vmatmul.msk.f32.vlgmr.msra.gmra.mxu1 %vm131_vm0, %v439_v46  ;;  %v210_v46 = vadd.f32 %v2072_v10, %v209_v45 }
 0x6f5   :  { %v800_v47 = vld [vmem:[#allocation4 + $0x10] sm:$0xff] }
 0x6f6   :  { %1542 = vmatmul.msk.f32.gmra.mxu3 %vm131_vm0, %v800_v47 }
 0x76b   :  { %v464_v50 = vpop.f32.mrf.mxu1 }
 0x76c   :  { %v467_v51 = vadd.f32 %v464_v50, %v204_v49 }
 0x76e   :  { %1604 = vtanh.f32 %v467_v51  ;;  %v1530_v53 = vmul.f32 -1.442695, %v467_v51 }
 0x770   :  { %1606 = vpow2.f32 %v1530_v53 }
 0x774   :  { %v1605_v52 = vpop.eup %1604 }
 0x775   :  { %491 = vrot.lane.b32.xlu1 %v1605_v52, %s1945_s16 }
 0x776   :  { %v1607_v54 = vpop.eup %1606 }
 0x777   :  { %v471_v55 = vadd.f32 1.0, %v1607_v54 }
 0x779   :  { %1608 = vrcp.f32 %v471_v55  ;;  %v483_v61 = vand.u32 2147483648, %v471_v55  ;;  %vm477_vm15 = vweird.f32 %v471_v55  ;;  %v481_v62 = vand.u32 2147483647, %v471_v55 }
 0x77b   :  { %v484_v1 = vor.u32 1.1754944e-38, %v483_v61  ;;  %vm482_vm3 = vcmp.eq.f32.partialorder %v481_v62, 8.507059e+37 }
 0x77f   :  { %v1609_v56 = vpop.eup %1608 }
 0x780   :  { %v473_v57 = vmul.f32 %v1609_v56, %v471_v55  ;;  %vm478_vm14 = vweird.f32 %v1609_v56 }
 0x781   :  { %vm479_vm2 = vmor %vm477_vm15, %vm478_vm14 }
 0x782   :  { %v474_v58 = vsub.f32 1.0, %v473_v57 }
 0x784   :  { %v475_v59 = vmul.f32 %v1609_v56, %v474_v58 }
 0x786   :  { %v476_v60 = vadd.f32 %v1609_v56, %v475_v59 }
 0x788   :  { %v480_v63 = vsel %vm479_vm2, %v1609_v56, %v476_v60 }
 0x789   :  { %v485_v4 = vsel %vm482_vm3, %v484_v1, %v480_v63 }
 0x78a   :  { %v489_v9 = vmul.f32 %v488_v8, %v485_v4 }
 0x7e7   :  { %v492_v3 = vpop.permute.xlu1 %491 }
 0x7e8   :  { %v494_v6 = vmul.f32 %v492_v3, %v485_v4 }
 0x7ea   :  { %496 = vrot.lane.b32.xlu2 %v494_v6, %s1946_s19 }
 0x844   :  { %v497_v11 = vpop.permute.xlu2 %496 }
 0x845   :  { %v499_v12 = vadd.f32 %v497_v11, %v489_v9  ;;  %v146_v11 = vld [vmem:[#allocation6 + $0x30] sm:$0xff] }
 0x846   :  { %1521 = vmatmul.msk.f32.gmra.mxu0 %vm152_vm1, %v146_v11 }
 0x847   :  { %1610 = vtanh.f32 %v499_v12  ;;  %v557_v35 = vmul.f32 0.7, %v499_v12 }
 0x84d   :  { %v1611_v13 = vpop.eup %1610 }
 0x84e   :  { %502 = vrot.lane.b32.xlu0 %v1611_v13, %s1945_s16 }
 0x8c0   :  { %v503_v14 = vpop.permute.xlu0 %502 }
 0x8c1   :  { %v505_v15 = vmul.f32 %v503_v14, %v485_v4  ;;  %v130_v14 = vld [vmem:[#allocation9 + $0x8] sm:$0xff] }
 0x8c2   :  { %133 = vst.msk [vmem:[#allocation2 + $0x8] sm:$0xff] %vm131_vm0, %v130_v14 }
 0x8c3   :  { %507 = vrot.lane.b32.xlu1 %v505_v15, %s1946_s19  ;;  %v2141_v15 = vld [vmem:[#allocation14 + $0x38] sm:$0xff] }
 0x8c4   :  { %909 = vmatpush.msra.mxu1 %v2141_v15 }
 0x8c6   :  { %910 = vmatpush.msra.mxu1 %v2143_v16 }
 0x935   :  { %v508_v17 = vpop.permute.xlu1 %507 }
 0x936   :  { %511 = vst.msk [vmem:[#allocation4 + $0x18] sm:$0xff] %vm131_vm0, %v508_v17  ;;  %1531 = vmatmul.msk.f32.vlgmr.msrb.gmra.mxu2 %vm131_vm0, %v508_v17  ;;  %v2148_v17 = vld [vmem:[#allocation14 + $0x28] sm:$0xff] }
 0x937   :  { %735 = vmatpush.msrb.mxu2 %v2037_v0  ;;  %911 = vmatpush.msra.mxu1 %v2148_v17 }
 0x939   :  { %736 = vmatpush.msrb.mxu2 %v2039_v2 }
 0x93b   :  { %737 = vmatpush.msrb.mxu2 %v2042_v5 }
 0x93d   :  { %v801_v18 = vld [vmem:[#allocation4 + $0x18] sm:$0xff]  ;;  %738 = vmatpush.msrb.mxu2 %v2048_v7 }
 0x93e   :  { %1543 = vmatmul.msk.f32.gmra.mxu3 %vm131_vm0, %v801_v18  ;;  %v2152_v18 = vld [vmem:[#allocation14 + $0x20] sm:$0xff] }
 0x93f   :  { %912 = vmatpush.msra.mxu1 %v2152_v18 }
 0x9b9   :  { %v533_v21 = vpop.f32.mrf.mxu2 }
 0x9ba   :  { %v536_v22 = vadd.f32 %v533_v21, %v207_v20  ;;  %v890_v20 = vld [vmem:[#allocation2 + $0x8] sm:$0xff] }
 0x9bc   :  { %1612 = vtanh.f32 %v536_v22  ;;  %v1532_v24 = vmul.f32 -1.442695, %v536_v22  ;;  %v135_v22 = vld [vmem:[#allocation11 + $0x8] sm:$0xff] }
 0x9bd   :  { %137 = vst.msk [vmem:[#allocation3 + $0x8] sm:$0xff] %vm131_vm0, %v135_v22 }
 0x9be   :  { %1614 = vpow2.f32 %v1532_v24 }
 0x9c2   :  { %v1613_v23 = vpop.eup %1612 }
 0x9c3   :  { %560 = vrot.lane.b32.xlu2 %v1613_v23, %s1945_s16  ;;  %v212_v23 = vpop.f32.mrf.mxu0 }
 0x9c4   :  { %v1615_v0 = vpop.eup %1614  ;;  %v213_v24 = vadd.f32 %v2072_v10, %v212_v23 }
 0x9c5   :  { %v540_v2 = vadd.f32 1.0, %v1615_v0 }
 0x9c7   :  { %1616 = vrcp.f32 %v540_v2  ;;  %v552_v28 = vand.u32 2147483648, %v540_v2  ;;  %vm546_vm5 = vweird.f32 %v540_v2  ;;  %v550_v29 = vand.u32 2147483647, %v540_v2 }
 0x9c9   :  { %v553_v31 = vor.u32 1.1754944e-38, %v552_v28  ;;  %vm551_vm7 = vcmp.eq.f32.partialorder %v550_v29, 8.507059e+37  ;;  %v892_v29 = vld [vmem:[#allocation3 + $0x8] sm:$0xff] }
 0x9cd   :  { %v1617_v5 = vpop.eup %1616 }
 0x9ce   :  { %v542_v25 = vmul.f32 %v1617_v5, %v540_v2  ;;  %vm547_vm4 = vweird.f32 %v1617_v5 }
 0x9cf   :  { %vm548_vm6 = vmor %vm546_vm5, %vm547_vm4 }
 0x9d0   :  { %v543_v26 = vsub.f32 1.0, %v542_v25  ;;  %v852_v25 = vpop.f32.mrf.mxu3 }
 0x9d2   :  { %v544_v7 = vmul.f32 %v1617_v5, %v543_v26 }
 0x9d4   :  { %v545_v27 = vadd.f32 %v1617_v5, %v544_v7 }
 0x9d6   :  { %v549_v30 = vsel %vm548_vm6, %v1617_v5, %v545_v27  ;;  %v2175_v5 = vld [vmem:[%s2318_s6 + $0x1] ss:$0 sm:$0xff] }
 0x9d7   :  { %v554_v33 = vsel %vm551_vm7, %v553_v31, %v549_v30  ;;  %v853_v26 = vadd.f32 %v2175_v5, %v852_v25  ;;  %v938_v30 = vmul.f32 0.7, %v892_v29 }
 0x9d8   :  { %v558_v36 = vmul.f32 %v557_v35, %v554_v33 }
 0xa1d   :  { %v561_v32 = vpop.permute.xlu2 %560 }
 0xa1e   :  { %v563_v34 = vmul.f32 %v561_v32, %v554_v33 }
 0xa20   :  { %565 = vrot.lane.b32.xlu0 %v563_v34, %s1946_s19 }
 0xa92   :  { %v566_v37 = vpop.permute.xlu0 %565 }
 0xa93   :  { %v568_v38 = vadd.f32 %v566_v37, %v558_v36 }
 0xa95   :  { %1618 = vtanh.f32 %v568_v38  ;;  %v626_v3 = vmul.f32 0.7, %v568_v38 }
 0xa9b   :  { %v1619_v39 = vpop.eup %1618 }
 0xa9c   :  { %571 = vrot.lane.b32.xlu1 %v1619_v39, %s1945_s16 }
 0xb0e   :  { %v572_v40 = vpop.permute.xlu1 %571 }
 0xb0f   :  { %v574_v41 = vmul.f32 %v572_v40, %v554_v33 }
 0xb11   :  { %576 = vrot.lane.b32.xlu2 %v574_v41, %s1946_s19 }
 0xb6b   :  { %v577_v43 = vpop.permute.xlu2 %576 }
 0xb6c   :  { %580 = vst.msk [vmem:[#allocation4 + $0x20] sm:$0xff] %vm131_vm0, %v577_v43  ;;  %1533 = vmatmul.msk.f32.vlgmr.msra.gmra.mxu2 %vm131_vm0, %v577_v43 }
 0xb6d   :  { %980 = vmatpush.msra.mxu2 %v2141_v15 }
 0xb6f   :  { %981 = vmatpush.msra.mxu2 %v2143_v16 }
 0xb71   :  { %982 = vmatpush.msra.mxu2 %v2148_v17 }
 0xb73   :  { %v802_v44 = vld [vmem:[#allocation4 + $0x20] sm:$0xff]  ;;  %983 = vmatpush.msra.mxu2 %v2152_v18 }
 0xb74   :  { %1544 = vmatmul.msk.f32.gmra.mxu3 %vm131_vm0, %v802_v44 }
 0xbef   :  { %v602_v47 = vpop.f32.mrf.mxu2 }
 0xbf0   :  { %v605_v48 = vadd.f32 %v602_v47, %v210_v46 }
 0xbf2   :  { %1620 = vtanh.f32 %v605_v48  ;;  %v1534_v50 = vmul.f32 -1.442695, %v605_v48 }
 0xbf4   :  { %1622 = vpow2.f32 %v1534_v50 }
 0xbf8   :  { %v1621_v49 = vpop.eup %1620 }
 0xbf9   :  { %629 = vrot.lane.b32.xlu0 %v1621_v49, %s1945_s16 }
 0xbfa   :  { %v1623_v51 = vpop.eup %1622 }
 0xbfb   :  { %v609_v52 = vadd.f32 1.0, %v1623_v51 }
 0xbfd   :  { %1624 = vrcp.f32 %v609_v52  ;;  %v621_v58 = vand.u32 2147483648, %v609_v52  ;;  %vm615_vm9 = vweird.f32 %v609_v52  ;;  %v619_v59 = vand.u32 2147483647, %v609_v52 }
 0xbff   :  { %v622_v61 = vor.u32 1.1754944e-38, %v621_v58  ;;  %vm620_vm11 = vcmp.eq.f32.partialorder %v619_v59, 8.507059e+37 }
 0xc03   :  { %v1625_v53 = vpop.eup %1624 }
 0xc04   :  { %v611_v54 = vmul.f32 %v1625_v53, %v609_v52  ;;  %vm616_vm8 = vweird.f32 %v1625_v53 }
 0xc05   :  { %vm617_vm10 = vmor %vm615_vm9, %vm616_vm8 }
 0xc06   :  { %v612_v55 = vsub.f32 1.0, %v611_v54 }
 0xc08   :  { %v613_v56 = vmul.f32 %v1625_v53, %v612_v55 }
 0xc0a   :  { %v614_v57 = vadd.f32 %v1625_v53, %v613_v56 }
 0xc0c   :  { %v618_v60 = vsel %vm617_vm10, %v1625_v53, %v614_v57 }
 0xc0d   :  { %v623_v63 = vsel %vm620_vm11, %v622_v61, %v618_v60 }
 0xc0e   :  { %v627_v4 = vmul.f32 %v626_v3, %v623_v63 }
 0xc6b   :  { %v630_v62 = vpop.permute.xlu0 %629 }
 0xc6c   :  { %v632_v1 = vmul.f32 %v630_v62, %v623_v63 }
 0xc6e   :  { %634 = vrot.lane.b32.xlu1 %v632_v1, %s1946_s19 }
 0xce0   :  { %v635_v6 = vpop.permute.xlu1 %634 }
 0xce1   :  { %v2135_v8 = vadd.f32 %v635_v6, %v627_v4 }
 0xce3   :  { %1626 = vtanh.f32 %v2135_v8  ;;  %v695_v4 = vmul.f32 0.7, %v2135_v8 }
 0xce9   :  { %v1627_v9 = vpop.eup %1626 }
 0xcea   :  { %640 = vrot.lane.b32.xlu2 %v1627_v9, %s1945_s16 }
 0xd44   :  { %v641_v12 = vpop.permute.xlu2 %640 }
 0xd45   :  { %v643_v13 = vmul.f32 %v641_v12, %v623_v63 }
 0xd47   :  { %645 = vrot.lane.b32.xlu0 %v643_v13, %s1946_s19 }
 0xdb9   :  { %v646_v19 = vpop.permute.xlu0 %645 }
 0xdba   :  { %649 = vst.msk [vmem:[#allocation4 + $0x28] sm:$0xff] %vm131_vm0, %v646_v19  ;;  %1535 = vmatmul.msk.f32.vlgmr.msrb.gmra.mxu1 %vm131_vm0, %v646_v19 }
 0xdbb   :  { %1048 = vmatpush.msrb.mxu1 %v2141_v15 }
 0xdbd   :  { %1049 = vmatpush.msrb.mxu1 %v2143_v16 }
 0xdbf   :  { %1050 = vmatpush.msrb.mxu1 %v2148_v17 }
 0xdc1   :  { %v803_v21 = vld [vmem:[#allocation4 + $0x28] sm:$0xff]  ;;  %1051 = vmatpush.msrb.mxu1 %v2152_v18 }
 0xdc2   :  { %1545 = vmatmul.msk.f32.gmra.mxu3 %vm131_vm0, %v803_v21  ;;  %1548 = vmatmul.msk.f32.vlgmr.msra.gmra.mxu1 %vm131_vm0, %v890_v20  ;;  %v147_v21 = vld [vmem:[#allocation6 + $0x38] sm:$0xff] }
 0xdc3   :  { %1184 = vmatpush.msra.mxu1 %v2141_v15  ;;  %1522 = vmatmul.msk.f32.gmra.mxu0 %vm152_vm1, %v147_v21 }
 0xdc5   :  { %1185 = vmatpush.msra.mxu1 %v2143_v16 }
 0xdc7   :  { %1186 = vmatpush.msra.mxu1 %v2148_v17 }
 0xdc9   :  { %1187 = vmatpush.msra.mxu1 %v2152_v18 }
 0xe37   :  { %v671_v0 = vpop.f32.mrf.mxu1 }
 0xe38   :  { %v674_v2 = vadd.f32 %v671_v0, %v213_v24  ;;  %v855_v0 = vpop.f32.mrf.mxu3 }
 0xe3a   :  { %1628 = vtanh.f32 %v674_v2  ;;  %v1536_v34 = vmul.f32 -1.442695, %v674_v2  ;;  %v856_v2 = vadd.f32 %v2175_v5, %v855_v0 }
 0xe3f   :  { %v914_v7 = vpop.f32.mrf.mxu1 }
 0xe40   :  { %v1629_v27 = vpop.eup %1628  ;;  %v917_v28 = vadd.f32 %v914_v7, %v853_v26 }
 0xe41   :  { %698 = vrot.lane.b32.xlu1 %v1629_v27, %s1945_s16 }
 0xe42   :  { %1630 = vtanh.f32 %v917_v28  ;;  %v1549_v31 = vmul.f32 -1.442695, %v917_v28 }
 0xe44   :  { %1632 = vpow2.f32 %v1549_v31 }
 0xe48   :  { %v1631_v10 = vpop.eup %1630 }
 0xe49   :  { %940 = vrot.lane.b32.xlu1 %v938_v30, %s1946_s19  ;;  %945 = vrot.lane.b32.xlu2 %v1631_v10, %s1945_s16 }
 0xe4a   :  { %v1633_v32 = vpop.eup %1632 }
 0xe4b   :  { %v921_v33 = vadd.f32 1.0, %v1633_v32 }
 0xe4d   :  { %1634 = vrcp.f32 %v921_v33  ;;  %v933_v43 = vand.u32 2147483648, %v921_v33  ;;  %vm927_vm13 = vweird.f32 %v921_v33  ;;  %v931_v44 = vand.u32 2147483647, %v921_v33 }
 0xe4e   :  { %1636 = vpow2.f32 %v1536_v34 }
 0xe4f   :  { %v934_v47 = vor.u32 1.1754944e-38, %v933_v43  ;;  %vm932_vm15 = vcmp.eq.f32.partialorder %v931_v44, 8.507059e+37 }
 0xe53   :  { %v1635_v35 = vpop.eup %1634 }
 0xe54   :  { %v1637_v36 = vpop.eup %1636  ;;  %v923_v37 = vmul.f32 %v1635_v35, %v921_v33  ;;  %vm928_vm12 = vweird.f32 %v1635_v35 }
 0xe55   :  { %v678_v38 = vadd.f32 1.0, %v1637_v36  ;;  %vm929_vm14 = vmor %vm927_vm13, %vm928_vm12 }
 0xe56   :  { %v924_v39 = vsub.f32 1.0, %v923_v37 }
 0xe57   :  { %1638 = vrcp.f32 %v678_v38  ;;  %v690_v54 = vand.u32 2147483648, %v678_v38  ;;  %vm684_vm3 = vweird.f32 %v678_v38  ;;  %v688_v55 = vand.u32 2147483647, %v678_v38 }
 0xe58   :  { %v925_v40 = vmul.f32 %v1635_v35, %v924_v39 }
 0xe59   :  { %v691_v57 = vor.u32 1.1754944e-38, %v690_v54  ;;  %vm689_vm5 = vcmp.eq.f32.partialorder %v688_v55, 8.507059e+37 }
 0xe5a   :  { %v926_v41 = vadd.f32 %v1635_v35, %v925_v40 }
 0xe5c   :  { %v930_v45 = vsel %vm929_vm14, %v1635_v35, %v926_v41 }
 0xe5d   :  { %v1639_v42 = vpop.eup %1638  ;;  %v935_v49 = vsel %vm932_vm15, %v934_v47, %v930_v45 }
 0xe5e   :  { %v680_v46 = vmul.f32 %v1639_v42, %v678_v38  ;;  %vm685_vm2 = vweird.f32 %v1639_v42 }
 0xe5f   :  { %vm686_vm4 = vmor %vm684_vm3, %vm685_vm2 }
 0xe60   :  { %v681_v51 = vsub.f32 1.0, %v680_v46 }
 0xe62   :  { %v682_v52 = vmul.f32 %v1639_v42, %v681_v51 }
 0xe64   :  { %v683_v53 = vadd.f32 %v1639_v42, %v682_v52 }
 0xe66   :  { %v687_v56 = vsel %vm686_vm4, %v1639_v42, %v683_v53 }
 0xe67   :  { %v692_v59 = vsel %vm689_vm5, %v691_v57, %v687_v56 }
 0xe68   :  { %v696_v6 = vmul.f32 %v695_v4, %v692_v59 }
 0xea3   :  { %v946_v48 = vpop.permute.xlu2 %945 }
 0xea4   :  { %v948_v50 = vmul.f32 %v946_v48, %v935_v49 }
 0xea6   :  { %950 = vrot.lane.b32.xlu2 %v948_v50, %s1946_s19 }
 0xeb3   :  { %v699_v58 = vpop.permute.xlu1 %698 }
 0xeb4   :  { %v701_v60 = vmul.f32 %v699_v58, %v692_v59 }
 0xeb6   :  { %703 = vrot.lane.b32.xlu0 %v701_v60, %s1946_s19 }
 0xebb   :  { %v941_v61 = vpop.permute.xlu1 %940 }
 0xebc   :  { %v943_v62 = vmul.f32 %v941_v61, %v935_v49 }
 0xf00   :  { %v951_v63 = vpop.permute.xlu2 %950 }
 0xf01   :  { %v2183_v1 = vadd.f32 %v951_v63, %v943_v62 }
 0xf03   :  { %1640 = vtanh.f32 %v2183_v1  ;;  %v1009_v41 = vmul.f32 0.7, %v2183_v1 }
 0xf09   :  { %v1641_v3 = vpop.eup %1640 }
 0xf0a   :  { %956 = vrot.lane.b32.xlu1 %v1641_v3, %s1945_s16 }
 0xf28   :  { %v704_v9 = vpop.permute.xlu0 %703 }
 0xf29   :  { %v2188_v11 = vadd.f32 %v704_v9, %v696_v6 }
 0xf2b   :  { %1642 = vtanh.f32 %v2188_v11 }
 0xf31   :  { %v1643_v12 = vpop.eup %1642 }
 0xf32   :  { %709 = vrot.lane.b32.xlu0 %v1643_v12, %s1945_s16 }
 0xf7c   :  { %v957_v13 = vpop.permute.xlu1 %956 }
 0xf7d   :  { %v959_v14 = vmul.f32 %v957_v13, %v935_v49  ;;  %v858_v49 = vpop.f32.mrf.mxu3 }
 0xf7e   :  { %v859_v50 = vadd.f32 %v2175_v5, %v858_v49 }
 0xf7f   :  { %961 = vrot.lane.b32.xlu0 %v959_v14, %s1946_s19 }
 0xfa4   :  { %v710_v19 = vpop.permute.xlu0 %709 }
 0xfa5   :  { %v712_v20 = vmul.f32 %v710_v19, %v692_v59 }
 0xfa7   :  { %714 = vrot.lane.b32.xlu2 %v712_v20, %s1946_s19 }
 0xff1   :  { %v962_v8 = vpop.permute.xlu0 %961 }
 0xff2   :  { %964 = vst.msk [vmem:[#allocation17] sm:$0xff] %vm131_vm0, %v962_v8 }
0x1001   :  { %v715_v22 = vpop.permute.xlu2 %714 }
0x1002   :  { %718 = vst.msk [vmem:[#allocation4 + $0x30] sm:$0xff] %vm131_vm0, %v715_v22  ;;  %1537 = vmatmul.msk.f32.vlgmr.msrb.gmra.mxu2 %vm131_vm0, %v715_v22 }
0x1003   :  { %1116 = vmatpush.msrb.mxu2 %v2141_v15 }
0x1005   :  { %1117 = vmatpush.msrb.mxu2 %v2143_v16 }
0x1007   :  { %1118 = vmatpush.msrb.mxu2 %v2148_v17 }
0x1009   :  { %v804_v23 = vld [vmem:[#allocation4 + $0x30] sm:$0xff]  ;;  %1119 = vmatpush.msrb.mxu2 %v2152_v18 }
0x100a   :  { %1546 = vmatmul.msk.f32.gmra.mxu3 %vm131_vm0, %v804_v23  ;;  %1550 = vmatmul.msk.f32.vlgmr.msra.gmra.mxu2 %vm131_vm0, %v962_v8  ;;  %v861_v23 = vpop.f32.mrf.mxu3 }
0x100b   :  { %1252 = vmatpush.msra.mxu2 %v2141_v15  ;;  %v862_v0 = vadd.f32 %v2175_v5, %v861_v23 }
0x100d   :  { %1253 = vmatpush.msra.mxu2 %v2143_v16 }
0x100f   :  { %1254 = vmatpush.msra.mxu2 %v2148_v17 }
0x1011   :  { %1255 = vmatpush.msra.mxu2 %v2152_v18 }
0x1085   :  { %v2208_v24 = vpop.f32.mrf.mxu2 }
0x108d   :  { %v985_v25 = vpop.f32.mrf.mxu2 }
0x108e   :  { %v988_v26 = vadd.f32 %v985_v25, %v856_v2 }
0x1090   :  { %1644 = vtanh.f32 %v988_v26  ;;  %v1551_v27 = vmul.f32 -1.442695, %v988_v26 }
0x1092   :  { %1646 = vpow2.f32 %v1551_v27 }
0x1096   :  { %v1645_v7 = vpop.eup %1644 }
0x1097   :  { %1012 = vrot.lane.b32.xlu1 %v1645_v7, %s1945_s16 }
0x1098   :  { %v1647_v28 = vpop.eup %1646 }
0x1099   :  { %v992_v29 = vadd.f32 1.0, %v1647_v28 }
0x109b   :  { %1648 = vrcp.f32 %v992_v29  ;;  %v1004_v34 = vand.u32 2147483648, %v992_v29  ;;  %vm998_vm6 = vweird.f32 %v992_v29  ;;  %v1002_v35 = vand.u32 2147483647, %v992_v29 }
0x109d   :  { %v1005_v37 = vor.u32 1.1754944e-38, %v1004_v34  ;;  %vm1003_vm8 = vcmp.eq.f32.partialorder %v1002_v35, 8.507059e+37 }
0x10a1   :  { %v1649_v30 = vpop.eup %1648 }
0x10a2   :  { %v994_v10 = vmul.f32 %v1649_v30, %v992_v29  ;;  %vm999_vm1 = vweird.f32 %v1649_v30 }
0x10a3   :  { %vm1000_vm7 = vmor %vm998_vm6, %vm999_vm1 }
0x10a4   :  { %v995_v31 = vsub.f32 1.0, %v994_v10 }
0x10a6   :  { %v996_v32 = vmul.f32 %v1649_v30, %v995_v31 }
0x10a8   :  { %v997_v33 = vadd.f32 %v1649_v30, %v996_v32 }
0x10aa   :  { %v1001_v36 = vsel %vm1000_vm7, %v1649_v30, %v997_v33 }
0x10ab   :  { %v1006_v39 = vsel %vm1003_vm8, %v1005_v37, %v1001_v36 }
0x10ac   :  { %v1010_v42 = vmul.f32 %v1009_v41, %v1006_v39 }
0x1109   :  { %v1013_v38 = vpop.permute.xlu1 %1012 }
0x110a   :  { %v1015_v40 = vmul.f32 %v1013_v38, %v1006_v39 }
0x110c   :  { %1017 = vrot.lane.b32.xlu2 %v1015_v40, %s1946_s19 }
0x1166   :  { %v1018_v43 = vpop.permute.xlu2 %1017 }
0x1167   :  { %v1020_v44 = vadd.f32 %v1018_v43, %v1010_v42 }
0x1169   :  { %1650 = vtanh.f32 %v1020_v44  ;;  %v1077_v12 = vmul.f32 0.7, %v1020_v44  ;;  %v864_v44 = vpop.f32.mrf.mxu3 }
0x116f   :  { %v1651_v45 = vpop.eup %1650 }
0x1170   :  { %1023 = vrot.lane.b32.xlu0 %v1651_v45, %s1945_s16  ;;  %v865_v45 = vadd.f32 %v2175_v5, %v864_v44 }
0x11e2   :  { %v1024_v46 = vpop.permute.xlu0 %1023 }
0x11e3   :  { %v1026_v47 = vmul.f32 %v1024_v46, %v1006_v39 }
0x11e5   :  { %1028 = vrot.lane.b32.xlu1 %v1026_v47, %s1946_s19 }
0x1257   :  { %v1029_v48 = vpop.permute.xlu1 %1028 }
0x1258   :  { %1032 = vst.msk [vmem:[#allocation17 + $0x8] sm:$0xff] %vm131_vm0, %v1029_v48  ;;  %1552 = vmatmul.msk.f32.vlgmr.msrb.gmra.mxu1 %vm131_vm0, %v1029_v48 }
0x1259   :  { %1320 = vmatpush.msrb.mxu1 %v2141_v15 }
0x125b   :  { %1321 = vmatpush.msrb.mxu1 %v2143_v16 }
0x125d   :  { %1322 = vmatpush.msrb.mxu1 %v2148_v17 }
0x125f   :  { %1323 = vmatpush.msrb.mxu1 %v2152_v18 }
0x12d5   :  { %v1053_v51 = vpop.f32.mrf.mxu1 }
0x12d6   :  { %v1056_v52 = vadd.f32 %v1053_v51, %v859_v50 }
0x12d8   :  { %1652 = vtanh.f32 %v1056_v52  ;;  %v1553_v54 = vmul.f32 -1.442695, %v1056_v52 }
0x12da   :  { %1654 = vpow2.f32 %v1553_v54 }
0x12de   :  { %v1653_v53 = vpop.eup %1652 }
0x12df   :  { %1080 = vrot.lane.b32.xlu2 %v1653_v53, %s1945_s16 }
0x12e0   :  { %v1655_v55 = vpop.eup %1654 }
0x12e1   :  { %v1060_v56 = vadd.f32 1.0, %v1655_v55 }
0x12e3   :  { %1656 = vrcp.f32 %v1060_v56  ;;  %v1072_v62 = vand.u32 2147483648, %v1060_v56  ;;  %vm1066_vm10 = vweird.f32 %v1060_v56  ;;  %v1070_v63 = vand.u32 2147483647, %v1060_v56 }
0x12e5   :  { %v1073_v3 = vor.u32 1.1754944e-38, %v1072_v62  ;;  %vm1071_vm12 = vcmp.eq.f32.partialorder %v1070_v63, 8.507059e+37 }
0x12e9   :  { %v1657_v57 = vpop.eup %1656 }
0x12ea   :  { %v1062_v58 = vmul.f32 %v1657_v57, %v1060_v56  ;;  %vm1067_vm9 = vweird.f32 %v1657_v57 }
0x12eb   :  { %vm1068_vm11 = vmor %vm1066_vm10, %vm1067_vm9 }
0x12ec   :  { %v1063_v59 = vsub.f32 1.0, %v1062_v58 }
0x12ee   :  { %v1064_v60 = vmul.f32 %v1657_v57, %v1063_v59 }
0x12f0   :  { %v1065_v61 = vadd.f32 %v1657_v57, %v1064_v60 }
0x12f2   :  { %v1069_v1 = vsel %vm1068_vm11, %v1657_v57, %v1065_v61 }
0x12f3   :  { %v1074_v6 = vsel %vm1071_vm12, %v1073_v3, %v1069_v1 }
0x12f4   :  { %v1078_v13 = vmul.f32 %v1077_v12, %v1074_v6 }
0x1339   :  { %v1081_v4 = vpop.permute.xlu2 %1080 }
0x133a   :  { %v1083_v9 = vmul.f32 %v1081_v4, %v1074_v6 }
0x133c   :  { %1085 = vrot.lane.b32.xlu0 %v1083_v9, %s1946_s19 }
0x13ae   :  { %v1086_v14 = vpop.permute.xlu0 %1085 }
0x13af   :  { %v1088_v19 = vadd.f32 %v1086_v14, %v1078_v13 }
0x13b1   :  { %1658 = vtanh.f32 %v1088_v19  ;;  %v1145_v36 = vmul.f32 0.7, %v1088_v19  ;;  %v867_v19 = vpop.f32.mrf.mxu3 }
0x13b7   :  { %v1659_v20 = vpop.eup %1658 }
0x13b8   :  { %1091 = vrot.lane.b32.xlu1 %v1659_v20, %s1945_s16  ;;  %v868_v20 = vadd.f32 %v2175_v5, %v867_v19 }
0x142a   :  { %v1092_v21 = vpop.permute.xlu1 %1091 }
0x142b   :  { %v1094_v8 = vmul.f32 %v1092_v21, %v1074_v6 }
0x142d   :  { %1096 = vrot.lane.b32.xlu2 %v1094_v8, %s1946_s19 }
0x1487   :  { %v1097_v22 = vpop.permute.xlu2 %1096 }
0x1488   :  { %1100 = vst.msk [vmem:[#allocation17 + $0x10] sm:$0xff] %vm131_vm0, %v1097_v22  ;;  %1554 = vmatmul.msk.f32.vlgmr.msrb.gmra.mxu2 %vm131_vm0, %v1097_v22 }
0x1489   :  { %1388 = vmatpush.msrb.mxu2 %v2141_v15 }
0x148b   :  { %1389 = vmatpush.msrb.mxu2 %v2143_v16 }
0x148d   :  { %1390 = vmatpush.msrb.mxu2 %v2148_v17 }
0x148f   :  { %1391 = vmatpush.msrb.mxu2 %v2152_v18 }
0x150b   :  { %v1121_v2 = vpop.f32.mrf.mxu2 }
0x150c   :  { %v1124_v25 = vadd.f32 %v1121_v2, %v862_v0 }
0x150e   :  { %1660 = vtanh.f32 %v1124_v25  ;;  %v1555_v7 = vmul.f32 -1.442695, %v1124_v25 }
0x1510   :  { %1662 = vpow2.f32 %v1555_v7 }
0x1514   :  { %v1661_v26 = vpop.eup %1660 }
0x1515   :  { %1148 = vrot.lane.b32.xlu0 %v1661_v26, %s1945_s16 }
0x1516   :  { %v1663_v27 = vpop.eup %1662 }
0x1517   :  { %v1128_v28 = vadd.f32 1.0, %v1663_v27 }
0x1519   :  { %1664 = vrcp.f32 %v1128_v28  ;;  %v1140_v18 = vand.u32 2147483648, %v1128_v28  ;;  %vm1134_vm14 = vweird.f32 %v1128_v28  ;;  %v1138_v10 = vand.u32 2147483647, %v1128_v28 }
0x151b   :  { %v1141_v32 = vor.u32 1.1754944e-38, %v1140_v18  ;;  %vm1139_vm2 = vcmp.eq.f32.partialorder %v1138_v10, 8.507059e+37 }
0x151f   :  { %v1665_v15 = vpop.eup %1664 }
0x1520   :  { %v1130_v16 = vmul.f32 %v1665_v15, %v1128_v28  ;;  %vm1135_vm13 = vweird.f32 %v1665_v15  ;;  %v215_v28 = vpop.f32.mrf.mxu0 }
0x1521   :  { %vm1136_vm15 = vmor %vm1134_vm14, %vm1135_vm13 }
0x1522   :  { %v1131_v29 = vsub.f32 1.0, %v1130_v16 }
0x1524   :  { %v1132_v17 = vmul.f32 %v1665_v15, %v1131_v29 }
0x1526   :  { %v1133_v30 = vadd.f32 %v1665_v15, %v1132_v17  ;;  %v1708_v17 = vld [vmem:[%s2318_s6] ss:$0 sm:$0xff]  ;;  %s1947_s6 = smov 96  }
0x1528   :  { %v1137_v31 = vsel %vm1136_vm15, %v1665_v15, %v1133_v30  ;;  %v216_v30 = vadd.f32 %v1708_v17, %v215_v28 }
0x1529   :  { %v1142_v34 = vsel %vm1139_vm2, %v1141_v32, %v1137_v31 }
0x152a   :  { %v1146_v37 = vmul.f32 %v1145_v36, %v1142_v34  ;;  %v743_v31 = vadd.f32 %v2208_v24, %v216_v30 }
0x152c   :  { %v1538_v24 = vmul.f32 -1.442695, %v743_v31 }
0x1587   :  { %v1149_v33 = vpop.permute.xlu0 %1148 }
0x1588   :  { %v1151_v35 = vmul.f32 %v1149_v33, %v1142_v34 }
0x158a   :  { %1153 = vrot.lane.b32.xlu1 %v1151_v35, %s1946_s19 }
0x15fc   :  { %v1154_v38 = vpop.permute.xlu1 %1153 }
0x15fd   :  { %v1156_v39 = vadd.f32 %v1154_v38, %v1146_v37 }
0x15ff   :  { %1666 = vtanh.f32 %v1156_v39  ;;  %v1213_v1 = vmul.f32 0.7, %v1156_v39 }
0x1605   :  { %v1667_v40 = vpop.eup %1666 }
0x1606   :  { %1159 = vrot.lane.b32.xlu2 %v1667_v40, %s1945_s16 }
0x1660   :  { %v1160_v41 = vpop.permute.xlu2 %1159 }
0x1661   :  { %v1162_v42 = vmul.f32 %v1160_v41, %v1142_v34 }
0x1663   :  { %1164 = vrot.lane.b32.xlu0 %v1162_v42, %s1946_s19 }
0x16d5   :  { %v1165_v43 = vpop.permute.xlu0 %1164 }
0x16d6   :  { %1168 = vst.msk [vmem:[#allocation17 + $0x18] sm:$0xff] %vm131_vm0, %v1165_v43  ;;  %1556 = vmatmul.msk.f32.vlgmr.msra.gmra.mxu1 %vm131_vm0, %v1165_v43 }
0x1753   :  { %v1189_v46 = vpop.f32.mrf.mxu1 }
0x1754   :  { %v1192_v47 = vadd.f32 %v1189_v46, %v865_v45 }
0x1756   :  { %1668 = vtanh.f32 %v1192_v47  ;;  %v1557_v49 = vmul.f32 -1.442695, %v1192_v47 }
0x1758   :  { %1670 = vpow2.f32 %v1557_v49 }
0x175c   :  { %v1669_v48 = vpop.eup %1668 }
0x175d   :  { %1216 = vrot.lane.b32.xlu1 %v1669_v48, %s1945_s16 }
0x175e   :  { %v1671_v50 = vpop.eup %1670 }
0x175f   :  { %v1196_v51 = vadd.f32 1.0, %v1671_v50 }
0x1761   :  { %1672 = vrcp.f32 %v1196_v51  ;;  %v1208_v57 = vand.u32 2147483648, %v1196_v51  ;;  %vm1202_vm4 = vweird.f32 %v1196_v51  ;;  %v1206_v58 = vand.u32 2147483647, %v1196_v51 }
0x1763   :  { %v1209_v60 = vor.u32 1.1754944e-38, %v1208_v57  ;;  %vm1207_vm1 = vcmp.eq.f32.partialorder %v1206_v58, 8.507059e+37  ;;  %v870_v58 = vpop.f32.mrf.mxu3 }
0x1767   :  { %v1673_v52 = vpop.eup %1672 }
0x1768   :  { %v1198_v53 = vmul.f32 %v1673_v52, %v1196_v51  ;;  %vm1203_vm3 = vweird.f32 %v1673_v52 }
0x1769   :  { %vm1204_vm5 = vmor %vm1202_vm4, %vm1203_vm3 }
0x176a   :  { %v1199_v54 = vsub.f32 1.0, %v1198_v53 }
0x176c   :  { %v1200_v55 = vmul.f32 %v1673_v52, %v1199_v54 }
0x176e   :  { %v1201_v56 = vadd.f32 %v1673_v52, %v1200_v55 }
0x1770   :  { %v1205_v59 = vsel %vm1204_vm5, %v1673_v52, %v1201_v56 }
0x1771   :  { %v1210_v62 = vsel %vm1207_vm1, %v1209_v60, %v1205_v59  ;;  %v871_v59 = vadd.f32 %v2175_v5, %v870_v58 }
0x1772   :  { %v1214_v3 = vmul.f32 %v1213_v1, %v1210_v62 }
0x17cf   :  { %v1217_v61 = vpop.permute.xlu1 %1216 }
0x17d0   :  { %v1219_v63 = vmul.f32 %v1217_v61, %v1210_v62 }
0x17d2   :  { %1221 = vrot.lane.b32.xlu2 %v1219_v63, %s1946_s19 }
0x182c   :  { %v1222_v4 = vpop.permute.xlu2 %1221 }
0x182d   :  { %v1224_v6 = vadd.f32 %v1222_v4, %v1214_v3 }
0x182f   :  { %1674 = vtanh.f32 %v1224_v6  ;;  %v1281_v36 = vmul.f32 0.7, %v1224_v6 }
0x1835   :  { %v1675_v9 = vpop.eup %1674 }
0x1836   :  { %1227 = vrot.lane.b32.xlu0 %v1675_v9, %s1945_s16 }
0x18a8   :  { %v1228_v12 = vpop.permute.xlu0 %1227 }
0x18a9   :  { %v1230_v13 = vmul.f32 %v1228_v12, %v1210_v62  ;;  %v764_v62 = vmul.f32 0.7, %v2188_v11 }
0x18ab   :  { %1232 = vrot.lane.b32.xlu1 %v1230_v13, %s1946_s19 }
0x191d   :  { %v1233_v14 = vpop.permute.xlu1 %1232 }
0x191e   :  { %1236 = vst.msk [vmem:[#allocation17 + $0x20] sm:$0xff] %vm131_vm0, %v1233_v14  ;;  %1558 = vmatmul.msk.f32.vlgmr.msra.gmra.mxu2 %vm131_vm0, %v1233_v14 }
0x19a1   :  { %v1257_v21 = vpop.f32.mrf.mxu2 }
0x19a2   :  { %v1260_v8 = vadd.f32 %v1257_v21, %v868_v20 }
0x19a4   :  { %1676 = vtanh.f32 %v1260_v8  ;;  %v1559_v23 = vmul.f32 -1.442695, %v1260_v8 }
0x19a6   :  { %1678 = vpow2.f32 %v1559_v23 }
0x19aa   :  { %v1677_v22 = vpop.eup %1676 }
0x19ab   :  { %1284 = vrot.lane.b32.xlu2 %v1677_v22, %s1945_s16 }
0x19ac   :  { %v1679_v0 = vpop.eup %1678 }
0x19ad   :  { %v1264_v2 = vadd.f32 1.0, %v1679_v0 }
0x19af   :  { %1680 = vrcp.f32 %v1264_v2  ;;  %v1276_v16 = vand.u32 2147483648, %v1264_v2  ;;  %vm1270_vm7 = vweird.f32 %v1264_v2  ;;  %v1274_v29 = vand.u32 2147483647, %v1264_v2 }
0x19b0   :  { %1682 = vtanh.f32 %v743_v31 }
0x19b1   :  { %v1277_v10 = vor.u32 1.1754944e-38, %v1276_v16  ;;  %vm1275_vm9 = vcmp.eq.f32.partialorder %v1274_v29, 8.507059e+37 }
0x19b5   :  { %v1681_v25 = vpop.eup %1680 }
0x19b6   :  { %v1266_v26 = vmul.f32 %v1681_v25, %v1264_v2  ;;  %vm1271_vm6 = vweird.f32 %v1681_v25  ;;  %v1683_v35 = vpop.eup %1682 }
0x19b7   :  { %vm1272_vm8 = vmor %vm1270_vm7, %vm1271_vm6 }
0x19b8   :  { %v1267_v7 = vsub.f32 1.0, %v1266_v26 }
0x19ba   :  { %v1268_v27 = vmul.f32 %v1681_v25, %v1267_v7 }
0x19bc   :  { %v1269_v15 = vadd.f32 %v1681_v25, %v1268_v27 }
0x19be   :  { %v1273_v18 = vsel %vm1272_vm8, %v1681_v25, %v1269_v15 }
0x19bf   :  { %v1278_v33 = vsel %vm1275_vm9, %v1277_v10, %v1273_v18 }
0x19c0   :  { %v1282_v37 = vmul.f32 %v1281_v36, %v1278_v33 }
0x1a05   :  { %v1285_v32 = vpop.permute.xlu2 %1284 }
0x1a06   :  { %v1287_v34 = vmul.f32 %v1285_v32, %v1278_v33 }
0x1a08   :  { %1289 = vrot.lane.b32.xlu0 %v1287_v34, %s1946_s19 }
0x1a10   :  { %767 = vrot.lane.b32.xlu0 %v1683_v35, %s1945_s16 }
0x1a7a   :  { %v1290_v38 = vpop.permute.xlu0 %1289 }
0x1a7b   :  { %v2255_v39 = vadd.f32 %v1290_v38, %v1282_v37 }
0x1a7d   :  { %1684 = vtanh.f32 %v2255_v39  ;;  %v1349_v28 = vmul.f32 0.7, %v2255_v39 }
0x1a7e   :  { %1686 = vpow2.f32 %v1538_v24 }
0x1a82   :  { %v768_v54 = vpop.permute.xlu0 %767 }
0x1a83   :  { %v1685_v40 = vpop.eup %1684 }
0x1a84   :  { %1295 = vrot.lane.b32.xlu1 %v1685_v40, %s1945_s16  ;;  %v1687_v41 = vpop.eup %1686 }
0x1a85   :  { %v747_v42 = vadd.f32 1.0, %v1687_v41 }
0x1a87   :  { %1688 = vrcp.f32 %v747_v42  ;;  %v759_v50 = vand.u32 2147483648, %v747_v42  ;;  %vm753_vm11 = vweird.f32 %v747_v42  ;;  %v757_v51 = vand.u32 2147483647, %v747_v42 }
0x1a89   :  { %v760_v53 = vor.u32 1.1754944e-38, %v759_v50  ;;  %vm758_vm13 = vcmp.eq.f32.partialorder %v757_v51, 8.507059e+37 }
0x1a8d   :  { %v1689_v43 = vpop.eup %1688 }
0x1a8e   :  { %v749_v44 = vmul.f32 %v1689_v43, %v747_v42  ;;  %vm754_vm10 = vweird.f32 %v1689_v43 }
0x1a8f   :  { %vm755_vm12 = vmor %vm753_vm11, %vm754_vm10 }
0x1a90   :  { %v750_v45 = vsub.f32 1.0, %v749_v44 }
0x1a92   :  { %v751_v46 = vmul.f32 %v1689_v43, %v750_v45 }
0x1a94   :  { %v752_v48 = vadd.f32 %v1689_v43, %v751_v46 }
0x1a96   :  { %v756_v52 = vsel %vm755_vm12, %v1689_v43, %v752_v48 }
0x1a97   :  { %v761_v55 = vsel %vm758_vm13, %v760_v53, %v756_v52 }
0x1a98   :  { %v770_v56 = vmul.f32 %v768_v54, %v761_v55  ;;  %v765_v1 = vmul.f32 %v764_v62, %v761_v55 }
0x1af6   :  { %v1296_v47 = vpop.permute.xlu1 %1295 }
0x1af7   :  { %v1298_v49 = vmul.f32 %v1296_v47, %v1278_v33 }
0x1af9   :  { %1300 = vrot.lane.b32.xlu2 %v1298_v49, %s1946_s19 }
0x1b01   :  { %772 = vrot.lane.b32.xlu2 %v770_v56, %s1946_s19 }
0x1b53   :  { %v1301_v57 = vpop.permute.xlu2 %1300 }
0x1b54   :  { %1304 = vst.msk [vmem:[#allocation17 + $0x28] sm:$0xff] %vm131_vm0, %v1301_v57  ;;  %1560 = vmatmul.msk.f32.vlgmr.msrb.gmra.mxu1 %vm131_vm0, %v1301_v57 }
0x1b5b   :  { %v773_v63 = vpop.permute.xlu2 %772 }
0x1b5c   :  { %v2265_v3 = vadd.f32 %v773_v63, %v765_v1 }
0x1bd1   :  { %v1325_v60 = vpop.f32.mrf.mxu1 }
0x1bd2   :  { %v1328_v61 = vadd.f32 %v1325_v60, %v871_v59 }
0x1bd4   :  { %1690 = vtanh.f32 %v1328_v61  ;;  %v1561_v9 = vmul.f32 -1.442695, %v1328_v61 }
0x1bd5   :  { %1692 = vtanh.f32 %v2265_v3 }
0x1bd6   :  { %1694 = vpow2.f32 %v1561_v9 }
0x1bda   :  { %v1691_v4 = vpop.eup %1690 }
0x1bdb   :  { %1352 = vrot.lane.b32.xlu1 %v1691_v4, %s1945_s16  ;;  %v1693_v6 = vpop.eup %1692 }
0x1bdc   :  { %v1695_v12 = vpop.eup %1694 }
0x1bdd   :  { %v1332_v13 = vadd.f32 1.0, %v1695_v12 }
0x1bdf   :  { %1696 = vrcp.f32 %v1332_v13  ;;  %v1344_v8 = vand.u32 2147483648, %v1332_v13  ;;  %vm1338_vm15 = vweird.f32 %v1332_v13  ;;  %v1342_v22 = vand.u32 2147483647, %v1332_v13 }
0x1be1   :  { %v1345_v0 = vor.u32 1.1754944e-38, %v1344_v8  ;;  %vm1343_vm3 = vcmp.eq.f32.partialorder %v1342_v22, 8.507059e+37 }
0x1be3   :  { %778 = vrot.lane.b32.xlu1 %v1693_v6, %s1945_s16 }
0x1be5   :  { %v1697_v14 = vpop.eup %1696 }
0x1be6   :  { %v1334_v11 = vmul.f32 %v1697_v14, %v1332_v13  ;;  %vm1339_vm14 = vweird.f32 %v1697_v14 }
0x1be7   :  { %vm1340_vm2 = vmor %vm1338_vm15, %vm1339_vm14 }
0x1be8   :  { %v1335_v19 = vsub.f32 1.0, %v1334_v11 }
0x1bea   :  { %v1336_v20 = vmul.f32 %v1697_v14, %v1335_v19 }
0x1bec   :  { %v1337_v21 = vadd.f32 %v1697_v14, %v1336_v20 }
0x1bee   :  { %v1341_v23 = vsel %vm1340_vm2, %v1697_v14, %v1337_v21 }
0x1bef   :  { %v1346_v25 = vsel %vm1343_vm3, %v1345_v0, %v1341_v23 }
0x1bf0   :  { %v1350_v15 = vmul.f32 %v1349_v28, %v1346_v25 }
0x1c4d   :  { %v1353_v2 = vpop.permute.xlu1 %1352 }
0x1c4e   :  { %v1355_v26 = vmul.f32 %v1353_v2, %v1346_v25 }
0x1c50   :  { %1357 = vrot.lane.b32.xlu0 %v1355_v26, %s1946_s19 }
0x1c55   :  { %v779_v7 = vpop.permute.xlu1 %778 }
0x1c56   :  { %v781_v27 = vmul.f32 %v779_v7, %v761_v55 }
0x1c58   :  { %783 = vrot.lane.b32.xlu0 %v781_v27, %s1946_s19 }
0x1cc2   :  { %v1358_v16 = vpop.permute.xlu0 %1357 }
0x1cc3   :  { %v1360_v29 = vadd.f32 %v1358_v16, %v1350_v15 }
0x1cc5   :  { %1698 = vtanh.f32 %v1360_v29  ;;  %v1417_v52 = vmul.f32 0.7, %v1360_v29 }
0x1cca   :  { %v784_v17 = vpop.permute.xlu0 %783 }
0x1ccb   :  { %v1699_v30 = vpop.eup %1698  ;;  %787 = vst.msk [vmem:[#allocation4 + $0x38] sm:$0xff] %vm131_vm0, %v784_v17 }
0x1ccc   :  { %788 = vst.msk [vmem:[#allocation2] sm:$0xff] %vm131_vm0, %v784_v17  ;;  %1363 = vrot.lane.b32.xlu2 %v1699_v30, %s1945_s16 }
0x1cd2   :  { %v805_v18 = vld [vmem:[#allocation4 + $0x38] sm:$0xff] }
0x1cd3   :  { %1547 = vmatmul.msk.f32.gmra.mxu3 %vm131_vm0, %v805_v18  ;;  %v1450_v10 = vld [vmem:[#allocation2] sm:$0xff] }
0x1cd4   :  { %1452 = vst.msk [vmem:[#allocation18] sm:$0xff] %vm131_vm0, %v1450_v10 }
0x1d26   :  { %v1364_v31 = vpop.permute.xlu2 %1363 }
0x1d27   :  { %v1366_v32 = vmul.f32 %v1364_v31, %v1346_v25 }
0x1d29   :  { %1368 = vrot.lane.b32.xlu1 %v1366_v32, %s1946_s19 }
0x1d56   :  { %v873_v34 = vpop.f32.mrf.mxu3 }
0x1d57   :  { %v874_v35 = vadd.f32 %v2175_v5, %v873_v34 }
0x1d9b   :  { %v1369_v33 = vpop.permute.xlu1 %1368 }
0x1d9c   :  { %1372 = vst.msk [vmem:[#allocation17 + $0x30] sm:$0xff] %vm131_vm0, %v1369_v33  ;;  %1562 = vmatmul.msk.f32.vlgmr.msrb.gmra.mxu2 %vm131_vm0, %v1369_v33 }
0x1e1f   :  { %v1393_v36 = vpop.f32.mrf.mxu2 }
0x1e20   :  { %v1396_v37 = vadd.f32 %v1393_v36, %v874_v35 }
0x1e22   :  { %1700 = vtanh.f32 %v1396_v37  ;;  %v1563_v39 = vmul.f32 -1.442695, %v1396_v37 }
0x1e24   :  { %1702 = vpow2.f32 %v1563_v39 }
0x1e28   :  { %v1701_v38 = vpop.eup %1700 }
0x1e29   :  { %1420 = vrot.lane.b32.xlu2 %v1701_v38, %s1945_s16 }
0x1e2a   :  { %v1703_v40 = vpop.eup %1702 }
0x1e2b   :  { %v1400_v24 = vadd.f32 1.0, %v1703_v40 }
0x1e2d   :  { %1704 = vrcp.f32 %v1400_v24  ;;  %v1412_v46 = vand.u32 2147483648, %v1400_v24  ;;  %vm1406_vm5 = vweird.f32 %v1400_v24  ;;  %v1410_v5 = vand.u32 2147483647, %v1400_v24 }
0x1e2f   :  { %v1413_v48 = vor.u32 1.1754944e-38, %v1412_v46  ;;  %vm1411_vm6 = vcmp.eq.f32.partialorder %v1410_v5, 8.507059e+37 }
0x1e33   :  { %v1705_v41 = vpop.eup %1704 }
0x1e34   :  { %v1402_v42 = vmul.f32 %v1705_v41, %v1400_v24  ;;  %vm1407_vm4 = vweird.f32 %v1705_v41 }
0x1e35   :  { %vm1408_vm1 = vmor %vm1406_vm5, %vm1407_vm4 }
0x1e36   :  { %v1403_v43 = vsub.f32 1.0, %v1402_v42 }
0x1e38   :  { %v1404_v44 = vmul.f32 %v1705_v41, %v1403_v43 }
0x1e3a   :  { %v1405_v45 = vadd.f32 %v1705_v41, %v1404_v44 }
0x1e3c   :  { %v1409_v47 = vsel %vm1408_vm1, %v1705_v41, %v1405_v45 }
0x1e3d   :  { %v1414_v50 = vsel %vm1411_vm6, %v1413_v48, %v1409_v47 }
0x1e3e   :  { %v1418_v53 = vmul.f32 %v1417_v52, %v1414_v50 }
0x1e83   :  { %v1421_v49 = vpop.permute.xlu2 %1420 }
0x1e84   :  { %v1423_v51 = vmul.f32 %v1421_v49, %v1414_v50 }
0x1e86   :  { %1425 = vrot.lane.b32.xlu0 %v1423_v51, %s1946_s19 }
0x1e8e   :  { %790 = vrot.lane.b32.xlu0 %v2265_v3, %s1947_s6 }
0x1ef8   :  { %v1426_v54 = vpop.permute.xlu0 %1425 }
0x1ef9   :  { %v1428_v55 = vadd.f32 %v1426_v54, %v1418_v53 }
0x1efb   :  { %1706 = vtanh.f32 %v1428_v55 }
0x1f00   :  { %v791_v56 = vpop.permute.xlu0 %790 }
0x1f01   :  { %v1707_v57 = vpop.eup %1706  ;;  %793 = vst.msk [vmem:[#allocation3] sm:$0xff] %vm131_vm0, %v791_v56 }
0x1f02   :  { %1431 = vrot.lane.b32.xlu1 %v1707_v57, %s1945_s16 }
0x1f08   :  { %v1454_v58 = vld [vmem:[#allocation3] sm:$0xff] }
0x1f09   :  { %1456 = vst.msk [vmem:[#allocation20] sm:$0xff] %vm131_vm0, %v1454_v58 }
0x1f0a   :  { %1443 = vrot.lane.b32.xlu1 %v1428_v55, %s1947_s6 }
0x1f74   :  { %v1432_v59 = vpop.permute.xlu1 %1431 }
0x1f75   :  { %v1434_v60 = vmul.f32 %v1432_v59, %v1414_v50 }
0x1f77   :  { %1436 = vrot.lane.b32.xlu2 %v1434_v60, %s1946_s19 }
0x1f7c   :  { %v1444_v61 = vpop.permute.xlu1 %1443 }
0x1f7d   :  { %1446 = vst.msk [vmem:[#allocation3 + $0x8] sm:$0xff] %vm131_vm0, %v1444_v61 }
0x1f84   :  { %v1455_v62 = vld [vmem:[#allocation3 + $0x8] sm:$0xff] }
0x1f85   :  { %1457 = vst.msk [vmem:[#allocation20 + $0x8] sm:$0xff] %vm131_vm0, %v1455_v62 }
0x1fd1   :  { %v1437_v63 = vpop.permute.xlu2 %1436 }
0x1fd2   :  { %1440 = vst.msk [vmem:[#allocation17 + $0x38] sm:$0xff] %vm131_vm0, %v1437_v63 }
0x1fd3   :  { %1441 = vst.msk [vmem:[#allocation2 + $0x8] sm:$0xff] %vm131_vm0, %v1437_v63  ;;  %1470 = dma.vmem_to_hbm [thread:$0]  %s1463_s23, 1024, %s1465_s26, [#allocation8], %s1938_s17, %s1938_s17, %s1939_s18  }
0x1fda   :  { %v1451_v1 = vld [vmem:[#allocation2 + $0x8] sm:$0xff] }
0x1fdb   :  { %1453 = vst.msk [vmem:[#allocation18 + $0x8] sm:$0xff] %vm131_vm0, %v1451_v1 }
0x1fdc   :  { %1483 = dma.vmem_to_hbm [thread:$0]  %s1476_s0, 256, %s1478_s30, [#allocation19], %s1938_s17, %s1938_s17, %s1939_s18  }
0x1fdd   :  { %1496 = dma.vmem_to_hbm [thread:$0]  %s1489_s10, 256, %s1491_s12, [#allocation19], %s1938_s17, %s1938_s17, %s1939_s18  }
0x1fde   :  { %1933 = dma.done.wait [#allocation8], 1024  }
0x1fdf   :  { %1934 = vsyncadd [#allocation8], 4294966272 }
0x1fe0   :  { %1935 = dma.done.wait [#allocation19], 512  }
0x1fe1   :  { %1936 = vsyncadd [#allocation19], 4294966784 }
0x1fe2   :  { %1509 = vsyncpa [#allocation7], 1 }
0x1fe3   :  { %1510 = vsyncpa [#allocation10], 1 }
0x1fe4   :  { %1511 = vsyncpa [#allocation13], 1 }
0x1fe5   :  { %1512 = vsyncpa [#allocation16], 1 }
0x1fe6   :  { %1513 = vsyncpa [#allocation8], 1 }
0x1fe7   :  { %1514 = vsyncpa [#allocation19], 1 }

</bundles_post_ra>
